<compile_context>
chip_gen: v7x
topology: tpu7x:2x2x1
jax: 0.10.0
libtpu: 0.0.40
codegen_flags: <defaults>
</compile_context>

<pallas_src>
import functools
import itertools

import numpy as np
import jax
import jax.numpy as jnp
from jax import lax
from jax.experimental import pallas as pl
from jax.experimental.pallas import tpu as pltpu


_LANES = 128
_COLS_PER_CELL = 36          # 9 anchors * 4 coords
_ROW_UNIT = 72               # lcm(8 sublanes, 9-row period of the 36/128 pattern)
_MAX_TILE_ROWS = 2304        # 2304 * 128 * 4 B = 1.125 MiB per f32 tile


# ----------------------------------------------------------------------------
# Kernel: one (tile_rows, 128) tile of the flat anchor element stream.
#   off_ref   : (tile_rows, 128) f32 -- per-lane additive offsets (stride-free
#               signed half sizes; y lanes also carry the +0.5 cell-center term)
#   lcell_ref : (tile_rows, 128) f32 -- tile-local cell index (flat_idx // 36),
#               exact small integers stored as f32
#   out_ref   : (tile_rows, 128) f32 -- flat anchor elements (lane dense)
#   levels    : static tuple of (start_elem, end_elem, cum_cells, n_cells,
#               grid_w, stride)
# ----------------------------------------------------------------------------
def _anchors_kernel(off_ref, lcell_ref, out_ref, *, levels, tile_rows,
                    total_elems):
    i = pl.program_id(0)
    tile_elems = tile_rows * _LANES
    cells_per_tile = tile_elems // _COLS_PER_CELL      # exact: tile_rows % 9 == 0
    # NOTE: int32 flat indices -- fine for any realistic image size
    # (e.g. 8192x8192 -> ~50M elements), no guard for pathological inputs.
    tile_base = i * tile_elems                          # first flat element of tile
    cell_base_f = (i * cells_per_tile).astype(jnp.float32)

    lane = lax.broadcasted_iota(jnp.int32, (tile_rows, _LANES), 1)
    is_y = (lane & 1) == 0          # y/x coordinate selector == lane parity
    lcell = lcell_ref[...]
    off_tab = off_ref[...]

    # Zero-init only tiles that contain padded tail elements (at most the last
    # one or two); interior tiles never pay this store.
    @pl.when(tile_base + tile_elems > total_elems)
    def _zero_tail():
        out_ref[...] = jnp.zeros_like(out_ref)

    for (start_e, end_e, cell0, n_cells, grid_w, stride) in levels:
        full = jnp.logical_and(tile_base >= start_e,
                               tile_base + tile_elems <= end_e)
        overlap = jnp.logical_and(tile_base < end_e,
                                  tile_base + tile_elems > start_e)
        partial = jnp.logical_and(overlap, jnp.logical_not(full))

        # cell-within-level + 0.5, as a scalar shift added to the lcell table.
        shift05 = cell_base_f + jnp.float32(0.5 - cell0)
        inv_gw = jnp.float32(1.0 / grid_w)
        gw_f = jnp.float32(grid_w)
        stride_f = jnp.float32(stride)

        def _values(shift05=shift05, inv_gw=inv_gw, gw_f=gw_f,
                    stride_f=stride_f):
            t05 = lcell + shift05                 # cell_in_level + 0.5 (exact f32)
            yi = jnp.floor(t05 * inv_gw)          # exact // grid_w (no int vdiv)
            xi5 = t05 - yi * gw_f                 # xi + 0.5
            coord = jnp.where(is_y, yi, xi5)
            return (coord + off_tab) * stride_f, t05

        @pl.when(full)                            # interior tile: single store
        def _full(values=_values):
            out_ref[...] = values()[0]

        @pl.when(partial)                         # boundary tile: masked merge
        def _partial(values=_values, n_cells=n_cells):
            val, t05 = values()
            in_lvl = jnp.logical_and(t05 >= jnp.float32(0.5),
                                     t05 < jnp.float32(n_cells + 0.5))
            out_ref[...] = jnp.where(in_lvl, val, out_ref[...])


# ----------------------------------------------------------------------------
# Host-side helpers
# ----------------------------------------------------------------------------
def _level_geometry(image_h, image_w, strides):
    levels = []
    cum_cells = 0
    for stride in strides:
        if image_w % stride != 0:
            raise ValueError('input size must be divided by the stride.')
        # TODO(synk): mirrors the torch module -- only W is checked against stride.
        grid_h = len(np.arange(stride / 2.0, image_h, stride))
        grid_w = len(np.arange(stride / 2.0, image_w, stride))
        nc = grid_h * grid_w
        levels.append((cum_cells * _COLS_PER_CELL,
                       (cum_cells + nc) * _COLS_PER_CELL,
                       cum_cells, nc, grid_w, stride))
        cum_cells += nc
    return tuple(levels), cum_cells


def _choose_tiling(rows):
    """tile_rows multiple of 72, n_tiles even and >= 2 (both v7x TCs busy)."""
    units = max(1, -(-rows // _ROW_UNIT))
    max_units = _MAX_TILE_ROWS // _ROW_UNIT
    n_tiles = 2
    while -(-units // n_tiles) > max_units:
        n_tiles += 2
    tile_rows = -(-units // n_tiles) * _ROW_UNIT
    return tile_rows, n_tiles


def _pattern_tables(anchor_scale, scales, ratios, tile_rows):
    # Per-column additive offsets: stride factored out; y columns also absorb
    # the +0.5 cell-center term (x columns get it via xi5 = xi + 0.5 in-kernel).
    off36 = np.zeros(_COLS_PER_CELL, np.float64)
    for a, (scale, ratio) in enumerate(itertools.product(scales, ratios)):
        half_x = anchor_scale * scale * ratio[0] / 2.0
        half_y = anchor_scale * scale * ratio[1] / 2.0
        off36[4 * a + 0] = 0.5 - half_y      # y_min
        off36[4 * a + 1] = -half_x           # x_min
        off36[4 * a + 2] = 0.5 + half_y      # y_max
        off36[4 * a + 3] = +half_x           # x_max
    flat = np.arange(tile_rows * _LANES, dtype=np.int64)
    off_tab = off36[flat % _COLS_PER_CELL].reshape(
        tile_rows, _LANES).astype(np.float32)
    # Tile-local cell index; values <= tile_rows*128/36 <= 8192 -> exact in f32.
    lcell_tab = (flat // _COLS_PER_CELL).astype(np.float32).reshape(
        tile_rows, _LANES)
    return off_tab, lcell_tab


def _build_anchors(image_h, image_w, anchor_scale, strides, scales, ratios):
    levels, total_cells = _level_geometry(image_h, image_w, strides)
    total_elems = total_cells * _COLS_PER_CELL

    rows = -(-total_elems // _LANES)
    tile_rows, n_tiles = _choose_tiling(rows)
    rows_padded = n_tiles * tile_rows

    off_tab, lcell_tab = _pattern_tables(anchor_scale, scales, ratios, tile_rows)

    kernel = functools.partial(_anchors_kernel, levels=levels,
                               tile_rows=tile_rows, total_elems=total_elems)
    out2d = pl.pallas_call(
        kernel,
        out_shape=jax.ShapeDtypeStruct((rows_padded, _LANES), jnp.float32),
        grid=(n_tiles,),
        # Constant block index (0, 0): the pipeline fetches these tables once
        # and skips re-DMA on subsequent grid steps.
        in_specs=[pl.BlockSpec((tile_rows, _LANES), lambda i: (0, 0)),
                  pl.BlockSpec((tile_rows, _LANES), lambda i: (0, 0))],
        out_specs=pl.BlockSpec((tile_rows, _LANES), lambda i: (i, 0)),
        compiler_params=pltpu.CompilerParams(
            dimension_semantics=("parallel",)),
    )(jnp.asarray(off_tab), jnp.asarray(lcell_tab))

    # Flat stream -> [1, total_anchors, 4]; only the tiny tail-trim slice copies.
    flat = out2d.reshape(-1)[:total_elems]
    return flat.reshape(1, total_cells * 9, 4)


class AnchorsPallas:
    """JAX/Pallas port of the PyTorch `Anchors` module."""

    def __init__(self, anchor_scale=4.0, pyramid_levels=None, **kwargs):
        self.anchor_scale = anchor_scale
        self.pyramid_levels = (pyramid_levels if pyramid_levels is not None
                               else [3, 4, 5, 6, 7])
        self.strides = kwargs.get("strides", [2 ** x for x in self.pyramid_levels])
        self.scales = list(kwargs.get(
            "scales", [2 ** 0, 2 ** (1.0 / 3.0), 2 ** (2.0 / 3.0)]))
        self.ratios = kwargs.get("ratios", [(1.0, 1.0), (1.4, 0.7), (0.7, 1.4)])
        # TODO(synk): Python-side cache mirrors the torch module's per-device
        # cache but is not jit/trace-safe.
        self.last_shape = None
        self.last_anchors = None

    def __call__(self, image, dtype=jnp.float32):
        # image is NCHW; only its spatial shape is used.
        image_shape = tuple(image.shape[2:])
        if image_shape == self.last_shape and self.last_anchors is not None:
            return self.last_anchors
        self.last_shape = image_shape
        h, w = image_shape
        anchors = _build_anchors(h, w, self.anchor_scale,
                                 self.strides, self.scales, self.ratios)
        anchors = anchors.astype(dtype)
        self.last_anchors = anchors
        return anchors


# ----------------------------------------------------------------------------
# Pure-numpy reference (mirror of the PyTorch forward) for correctness check.
# ----------------------------------------------------------------------------
def _numpy_reference(image_shape, anchor_scale, strides, scales, ratios):
    boxes_all = []
    for stride in strides:
        boxes_level = []
        for scale, ratio in itertools.product(scales, ratios):
            base_anchor_size = anchor_scale * stride * scale
            anchor_size_x_2 = base_anchor_size * ratio[0] / 2.0
            anchor_size_y_2 = base_anchor_size * ratio[1] / 2.0
            x = np.arange(stride / 2, image_shape[1], stride)
            y = np.arange(stride / 2, image_shape[0], stride)
            xv, yv = np.meshgrid(x, y)
            xv = xv.reshape(-1)
            yv = yv.reshape(-1)
            boxes = np.vstack((yv - anchor_size_y_2, xv - anchor_size_x_2,
                               yv + anchor_size_y_2, xv + anchor_size_x_2))
            boxes = np.swapaxes(boxes, 0, 1)
            boxes_level.append(np.expand_dims(boxes, axis=1))
        boxes_level = np.concatenate(boxes_level, axis=1)
        boxes_all.append(boxes_level.reshape([-1, 4]))
    return np.vstack(boxes_all).astype(np.float32)[None, ...]


if __name__ == "__main__":
    # Image must be divisible by the largest stride 2**7 = 128 (smallest legal
    # spatial size for the default pyramid levels).
    key = jax.random.PRNGKey(0)
    image = jax.random.normal(key, (2, 3, 128, 128), dtype=jnp.float32)  # NCHW

    anchors = AnchorsPallas()
    out = anchors(image)
    out = jax.block_until_ready(out)

    ref = _numpy_reference(
        (128, 128), anchors.anchor_scale, anchors.strides, anchors.scales,
        anchors.ratios)
    assert out.shape == ref.shape, (out.shape, ref.shape)
    np.testing.assert_allclose(np.asarray(out), ref, rtol=1e-5, atol=1e-3)

    print("KERNEL_OK")
</pallas_src>

<mosaic_0001>
module attributes {stable_mosaic.version = 11 : i64} {
  func.func @_anchors_kernel(%arg0: i32, %arg1: memref<72x128xf32, #tpu.memory_space<vmem>>, %arg2: memref<72x128xf32, #tpu.memory_space<vmem>>, %arg3: memref<72x128xf32, #tpu.memory_space<vmem>>) attributes {dimension_semantics = [#tpu.dimension_semantics<parallel>], iteration_bounds = array<i64: 2>, scalar_prefetch = 0 : i64, scratch_operands = 0 : i64, tpu.core_type = #tpu.core_type<tc>, window_params = [{pipeline_mode = #tpu.pipeline_mode<synchronous>, transform_indices = @transform_0, window_bounds = array<i64: 72, 128>}, {pipeline_mode = #tpu.pipeline_mode<synchronous>, transform_indices = @transform_1, window_bounds = array<i64: 72, 128>}, {transform_indices = @transform_2, window_bounds = array<i64: 72, 128>}]} {
    %c9216_i32 = arith.constant 9216 : i32
    %0 = arith.muli %arg0, %c9216_i32 : i32
    %c256_i32 = arith.constant 256 : i32
    %1 = arith.muli %arg0, %c256_i32 : i32
    %2 = arith.sitofp %1 : i32 to f32
    %3 = tpu.iota {dimensions = array<i32: 1>} : vector<72x128xi32>
    %c1_i32 = arith.constant 1 : i32
    %4 = vector.broadcast %c1_i32 : i32 to vector<72x128xi32>
    %5 = arith.andi %3, %4 : vector<72x128xi32>
    %c0_i32 = arith.constant 0 : i32
    %6 = vector.broadcast %c0_i32 : i32 to vector<72x128xi32>
    %7 = arith.cmpi eq, %5, %6 : vector<72x128xi32>
    %c0 = arith.constant 0 : index
    %c0_0 = arith.constant 0 : index
    %8 = vector.load %arg2[%c0, %c0_0] : memref<72x128xf32, #tpu.memory_space<vmem>>, vector<72x128xf32>
    %c0_1 = arith.constant 0 : index
    %c0_2 = arith.constant 0 : index
    %9 = vector.load %arg1[%c0_1, %c0_2] : memref<72x128xf32, #tpu.memory_space<vmem>>, vector<72x128xf32>
    %c9216_i32_3 = arith.constant 9216 : i32
    %10 = arith.addi %0, %c9216_i32_3 : i32
    %c12276_i32 = arith.constant 12276 : i32
    %11 = arith.cmpi sgt, %10, %c12276_i32 : i32
    %12 = arith.extui %11 : i1 to i32
    %c0_i32_4 = arith.constant 0 : i32
    %13 = arith.cmpi ne, %12, %c0_i32_4 : i32
    scf.if %13 {
      %cst_80 = arith.constant 0.000000e+00 : f32
      %89 = vector.broadcast %cst_80 : f32 to vector<72x128xf32>
      %c0_81 = arith.constant 0 : index
      %c0_82 = arith.constant 0 : index
      %90 = vector.load %arg3[%c0_81, %c0_82] : memref<72x128xf32, #tpu.memory_space<vmem>>, vector<72x128xf32>
      tpu.vector_store %arg3[%c0_81, %c0_82], %89 {strides = array<i32>} : memref<72x128xf32, #tpu.memory_space<vmem>>, vector<72x128xf32>,
    } else {
    }
    %c0_i32_5 = arith.constant 0 : i32
    %14 = arith.cmpi sge, %0, %c0_i32_5 : i32
    %c9216_i32_6 = arith.constant 9216 : i32
    %15 = arith.addi %0, %c9216_i32_6 : i32
    %c9216_i32_7 = arith.constant 9216 : i32
    %16 = arith.cmpi sle, %15, %c9216_i32_7 : i32
    %17 = arith.andi %14, %16 : i1
    %c9216_i32_8 = arith.constant 9216 : i32
    %18 = arith.cmpi slt, %0, %c9216_i32_8 : i32
    %c9216_i32_9 = arith.constant 9216 : i32
    %19 = arith.addi %0, %c9216_i32_9 : i32
    %c0_i32_10 = arith.constant 0 : i32
    %20 = arith.cmpi sgt, %19, %c0_i32_10 : i32
    %21 = arith.andi %18, %20 : i1
    %true = arith.constant true
    %22 = arith.xori %17, %true : i1
    %23 = arith.andi %21, %22 : i1
    %cst = arith.constant 5.000000e-01 : f32
    %24 = arith.addf %2, %cst : f32
    %25 = arith.extui %17 : i1 to i32
    %cst_11 = arith.constant 6.250000e-02 : f32
    %cst_12 = arith.constant 1.600000e+01 : f32
    %cst_13 = arith.constant 8.000000e+00 : f32
    %c0_i32_14 = arith.constant 0 : i32
    %26 = arith.cmpi ne, %25, %c0_i32_14 : i32
    scf.if %26 {
      %89 = vector.broadcast %24 : f32 to vector<72x128xf32>
      %90 = arith.addf %8, %89 : vector<72x128xf32>
      %91 = vector.broadcast %cst_11 : f32 to vector<72x128xf32>
      %92 = arith.mulf %90, %91 : vector<72x128xf32>
      %93 = math.floor %92 : vector<72x128xf32>
      %94 = vector.broadcast %cst_12 : f32 to vector<72x128xf32>
      %95 = arith.mulf %93, %94 : vector<72x128xf32>
      %96 = arith.subf %90, %95 : vector<72x128xf32>
      %97 = arith.select %7, %93, %96 : vector<72x128xi1>, vector<72x128xf32>
      %98 = arith.addf %97, %9 : vector<72x128xf32>
      %99 = vector.broadcast %cst_13 : f32 to vector<72x128xf32>
      %100 = arith.mulf %98, %99 : vector<72x128xf32>
      %c0_80 = arith.constant 0 : index
      %c0_81 = arith.constant 0 : index
      %101 = vector.load %arg3[%c0_80, %c0_81] : memref<72x128xf32, #tpu.memory_space<vmem>>, vector<72x128xf32>
      tpu.vector_store %arg3[%c0_80, %c0_81], %100 {strides = array<i32>} : memref<72x128xf32, #tpu.memory_space<vmem>>, vector<72x128xf32>,
    } else {
    }
    %27 = arith.extui %23 : i1 to i32
    %cst_15 = arith.constant 6.250000e-02 : f32
    %cst_16 = arith.constant 1.600000e+01 : f32
    %cst_17 = arith.constant 8.000000e+00 : f32
    %c0_i32_18 = arith.constant 0 : i32
    %28 = arith.cmpi ne, %27, %c0_i32_18 : i32
    scf.if %28 {
      %89 = vector.broadcast %24 : f32 to vector<72x128xf32>
      %90 = arith.addf %8, %89 : vector<72x128xf32>
      %91 = vector.broadcast %cst_15 : f32 to vector<72x128xf32>
      %92 = arith.mulf %90, %91 : vector<72x128xf32>
      %93 = math.floor %92 : vector<72x128xf32>
      %94 = vector.broadcast %cst_16 : f32 to vector<72x128xf32>
      %95 = arith.mulf %93, %94 : vector<72x128xf32>
      %96 = arith.subf %90, %95 : vector<72x128xf32>
      %97 = arith.select %7, %93, %96 : vector<72x128xi1>, vector<72x128xf32>
      %98 = arith.addf %97, %9 : vector<72x128xf32>
      %99 = vector.broadcast %cst_17 : f32 to vector<72x128xf32>
      %100 = arith.mulf %98, %99 : vector<72x128xf32>
      %cst_80 = arith.constant 5.000000e-01 : f32
      %101 = vector.broadcast %cst_80 : f32 to vector<72x128xf32>
      %102 = arith.cmpf oge, %90, %101 : vector<72x128xf32>
      %cst_81 = arith.constant 2.565000e+02 : f32
      %103 = vector.broadcast %cst_81 : f32 to vector<72x128xf32>
      %104 = arith.cmpf olt, %90, %103 : vector<72x128xf32>
      %105 = arith.andi %102, %104 : vector<72x128xi1>
      %c0_82 = arith.constant 0 : index
      %c0_83 = arith.constant 0 : index
      %106 = vector.load %arg3[%c0_82, %c0_83] : memref<72x128xf32, #tpu.memory_space<vmem>>, vector<72x128xf32>
      %107 = arith.select %105, %100, %106 : vector<72x128xi1>, vector<72x128xf32>
      %c0_84 = arith.constant 0 : index
      %c0_85 = arith.constant 0 : index
      %108 = vector.load %arg3[%c0_84, %c0_85] : memref<72x128xf32, #tpu.memory_space<vmem>>, vector<72x128xf32>
      tpu.vector_store %arg3[%c0_84, %c0_85], %107 {strides = array<i32>} : memref<72x128xf32, #tpu.memory_space<vmem>>, vector<72x128xf32>,
    } else {
    }
    %c9216_i32_19 = arith.constant 9216 : i32
    %29 = arith.cmpi sge, %0, %c9216_i32_19 : i32
    %c9216_i32_20 = arith.constant 9216 : i32
    %30 = arith.addi %0, %c9216_i32_20 : i32
    %c11520_i32 = arith.constant 11520 : i32
    %31 = arith.cmpi sle, %30, %c11520_i32 : i32
    %32 = arith.andi %29, %31 : i1
    %c11520_i32_21 = arith.constant 11520 : i32
    %33 = arith.cmpi slt, %0, %c11520_i32_21 : i32
    %c9216_i32_22 = arith.constant 9216 : i32
    %34 = arith.addi %0, %c9216_i32_22 : i32
    %c9216_i32_23 = arith.constant 9216 : i32
    %35 = arith.cmpi sgt, %34, %c9216_i32_23 : i32
    %36 = arith.andi %33, %35 : i1
    %true_24 = arith.constant true
    %37 = arith.xori %32, %true_24 : i1
    %38 = arith.andi %36, %37 : i1
    %cst_25 = arith.constant -2.555000e+02 : f32
    %39 = arith.addf %2, %cst_25 : f32
    %40 = arith.extui %32 : i1 to i32
    %cst_26 = arith.constant 1.250000e-01 : f32
    %cst_27 = arith.constant 8.000000e+00 : f32
    %cst_28 = arith.constant 1.600000e+01 : f32
    %c0_i32_29 = arith.constant 0 : i32
    %41 = arith.cmpi ne, %40, %c0_i32_29 : i32
    scf.if %41 {
      %89 = vector.broadcast %39 : f32 to vector<72x128xf32>
      %90 = arith.addf %8, %89 : vector<72x128xf32>
      %91 = vector.broadcast %cst_26 : f32 to vector<72x128xf32>
      %92 = arith.mulf %90, %91 : vector<72x128xf32>
      %93 = math.floor %92 : vector<72x128xf32>
      %94 = vector.broadcast %cst_27 : f32 to vector<72x128xf32>
      %95 = arith.mulf %93, %94 : vector<72x128xf32>
      %96 = arith.subf %90, %95 : vector<72x128xf32>
      %97 = arith.select %7, %93, %96 : vector<72x128xi1>, vector<72x128xf32>
      %98 = arith.addf %97, %9 : vector<72x128xf32>
      %99 = vector.broadcast %cst_28 : f32 to vector<72x128xf32>
      %100 = arith.mulf %98, %99 : vector<72x128xf32>
      %c0_80 = arith.constant 0 : index
      %c0_81 = arith.constant 0 : index
      %101 = vector.load %arg3[%c0_80, %c0_81] : memref<72x128xf32, #tpu.memory_space<vmem>>, vector<72x128xf32>
      tpu.vector_store %arg3[%c0_80, %c0_81], %100 {strides = array<i32>} : memref<72x128xf32, #tpu.memory_space<vmem>>, vector<72x128xf32>,
    } else {
    }
    %42 = arith.extui %38 : i1 to i32
    %cst_30 = arith.constant 1.250000e-01 : f32
    %cst_31 = arith.constant 8.000000e+00 : f32
    %cst_32 = arith.constant 1.600000e+01 : f32
    %c0_i32_33 = arith.constant 0 : i32
    %43 = arith.cmpi ne, %42, %c0_i32_33 : i32
    scf.if %43 {
      %89 = vector.broadcast %39 : f32 to vector<72x128xf32>
      %90 = arith.addf %8, %89 : vector<72x128xf32>
      %91 = vector.broadcast %cst_30 : f32 to vector<72x128xf32>
      %92 = arith.mulf %90, %91 : vector<72x128xf32>
      %93 = math.floor %92 : vector<72x128xf32>
      %94 = vector.broadcast %cst_31 : f32 to vector<72x128xf32>
      %95 = arith.mulf %93, %94 : vector<72x128xf32>
      %96 = arith.subf %90, %95 : vector<72x128xf32>
      %97 = arith.select %7, %93, %96 : vector<72x128xi1>, vector<72x128xf32>
      %98 = arith.addf %97, %9 : vector<72x128xf32>
      %99 = vector.broadcast %cst_32 : f32 to vector<72x128xf32>
      %100 = arith.mulf %98, %99 : vector<72x128xf32>
      %cst_80 = arith.constant 5.000000e-01 : f32
      %101 = vector.broadcast %cst_80 : f32 to vector<72x128xf32>
      %102 = arith.cmpf oge, %90, %101 : vector<72x128xf32>
      %cst_81 = arith.constant 6.450000e+01 : f32
      %103 = vector.broadcast %cst_81 : f32 to vector<72x128xf32>
      %104 = arith.cmpf olt, %90, %103 : vector<72x128xf32>
      %105 = arith.andi %102, %104 : vector<72x128xi1>
      %c0_82 = arith.constant 0 : index
      %c0_83 = arith.constant 0 : index
      %106 = vector.load %arg3[%c0_82, %c0_83] : memref<72x128xf32, #tpu.memory_space<vmem>>, vector<72x128xf32>
      %107 = arith.select %105, %100, %106 : vector<72x128xi1>, vector<72x128xf32>
      %c0_84 = arith.constant 0 : index
      %c0_85 = arith.constant 0 : index
      %108 = vector.load %arg3[%c0_84, %c0_85] : memref<72x128xf32, #tpu.memory_space<vmem>>, vector<72x128xf32>
      tpu.vector_store %arg3[%c0_84, %c0_85], %107 {strides = array<i32>} : memref<72x128xf32, #tpu.memory_space<vmem>>, vector<72x128xf32>,
    } else {
    }
    %c11520_i32_34 = arith.constant 11520 : i32
    %44 = arith.cmpi sge, %0, %c11520_i32_34 : i32
    %c9216_i32_35 = arith.constant 9216 : i32
    %45 = arith.addi %0, %c9216_i32_35 : i32
    %c12096_i32 = arith.constant 12096 : i32
    %46 = arith.cmpi sle, %45, %c12096_i32 : i32
    %47 = arith.andi %44, %46 : i1
    %c12096_i32_36 = arith.constant 12096 : i32
    %48 = arith.cmpi slt, %0, %c12096_i32_36 : i32
    %c9216_i32_37 = arith.constant 9216 : i32
    %49 = arith.addi %0, %c9216_i32_37 : i32
    %c11520_i32_38 = arith.constant 11520 : i32
    %50 = arith.cmpi sgt, %49, %c11520_i32_38 : i32
    %51 = arith.andi %48, %50 : i1
    %true_39 = arith.constant true
    %52 = arith.xori %47, %true_39 : i1
    %53 = arith.andi %51, %52 : i1
    %cst_40 = arith.constant -3.195000e+02 : f32
    %54 = arith.addf %2, %cst_40 : f32
    %55 = arith.extui %47 : i1 to i32
    %cst_41 = arith.constant 2.500000e-01 : f32
    %cst_42 = arith.constant 4.000000e+00 : f32
    %cst_43 = arith.constant 3.200000e+01 : f32
    %c0_i32_44 = arith.constant 0 : i32
    %56 = arith.cmpi ne, %55, %c0_i32_44 : i32
    scf.if %56 {
      %89 = vector.broadcast %54 : f32 to vector<72x128xf32>
      %90 = arith.addf %8, %89 : vector<72x128xf32>
      %91 = vector.broadcast %cst_41 : f32 to vector<72x128xf32>
      %92 = arith.mulf %90, %91 : vector<72x128xf32>
      %93 = math.floor %92 : vector<72x128xf32>
      %94 = vector.broadcast %cst_42 : f32 to vector<72x128xf32>
      %95 = arith.mulf %93, %94 : vector<72x128xf32>
      %96 = arith.subf %90, %95 : vector<72x128xf32>
      %97 = arith.select %7, %93, %96 : vector<72x128xi1>, vector<72x128xf32>
      %98 = arith.addf %97, %9 : vector<72x128xf32>
      %99 = vector.broadcast %cst_43 : f32 to vector<72x128xf32>
      %100 = arith.mulf %98, %99 : vector<72x128xf32>
      %c0_80 = arith.constant 0 : index
      %c0_81 = arith.constant 0 : index
      %101 = vector.load %arg3[%c0_80, %c0_81] : memref<72x128xf32, #tpu.memory_space<vmem>>, vector<72x128xf32>
      tpu.vector_store %arg3[%c0_80, %c0_81], %100 {strides = array<i32>} : memref<72x128xf32, #tpu.memory_space<vmem>>, vector<72x128xf32>,
    } else {
    }
    %57 = arith.extui %53 : i1 to i32
    %cst_45 = arith.constant 2.500000e-01 : f32
    %cst_46 = arith.constant 4.000000e+00 : f32
    %cst_47 = arith.constant 3.200000e+01 : f32
    %c0_i32_48 = arith.constant 0 : i32
    %58 = arith.cmpi ne, %57, %c0_i32_48 : i32
    scf.if %58 {
      %89 = vector.broadcast %54 : f32 to vector<72x128xf32>
      %90 = arith.addf %8, %89 : vector<72x128xf32>
      %91 = vector.broadcast %cst_45 : f32 to vector<72x128xf32>
      %92 = arith.mulf %90, %91 : vector<72x128xf32>
      %93 = math.floor %92 : vector<72x128xf32>
      %94 = vector.broadcast %cst_46 : f32 to vector<72x128xf32>
      %95 = arith.mulf %93, %94 : vector<72x128xf32>
      %96 = arith.subf %90, %95 : vector<72x128xf32>
      %97 = arith.select %7, %93, %96 : vector<72x128xi1>, vector<72x128xf32>
      %98 = arith.addf %97, %9 : vector<72x128xf32>
      %99 = vector.broadcast %cst_47 : f32 to vector<72x128xf32>
      %100 = arith.mulf %98, %99 : vector<72x128xf32>
      %cst_80 = arith.constant 5.000000e-01 : f32
      %101 = vector.broadcast %cst_80 : f32 to vector<72x128xf32>
      %102 = arith.cmpf oge, %90, %101 : vector<72x128xf32>
      %cst_81 = arith.constant 1.650000e+01 : f32
      %103 = vector.broadcast %cst_81 : f32 to vector<72x128xf32>
      %104 = arith.cmpf olt, %90, %103 : vector<72x128xf32>
      %105 = arith.andi %102, %104 : vector<72x128xi1>
      %c0_82 = arith.constant 0 : index
      %c0_83 = arith.constant 0 : index
      %106 = vector.load %arg3[%c0_82, %c0_83] : memref<72x128xf32, #tpu.memory_space<vmem>>, vector<72x128xf32>
      %107 = arith.select %105, %100, %106 : vector<72x128xi1>, vector<72x128xf32>
      %c0_84 = arith.constant 0 : index
      %c0_85 = arith.constant 0 : index
      %108 = vector.load %arg3[%c0_84, %c0_85] : memref<72x128xf32, #tpu.memory_space<vmem>>, vector<72x128xf32>
      tpu.vector_store %arg3[%c0_84, %c0_85], %107 {strides = array<i32>} : memref<72x128xf32, #tpu.memory_space<vmem>>, vector<72x128xf32>,
    } else {
    }
    %c12096_i32_49 = arith.constant 12096 : i32
    %59 = arith.cmpi sge, %0, %c12096_i32_49 : i32
    %c9216_i32_50 = arith.constant 9216 : i32
    %60 = arith.addi %0, %c9216_i32_50 : i32
    %c12240_i32 = arith.constant 12240 : i32
    %61 = arith.cmpi sle, %60, %c12240_i32 : i32
    %62 = arith.andi %59, %61 : i1
    %c12240_i32_51 = arith.constant 12240 : i32
    %63 = arith.cmpi slt, %0, %c12240_i32_51 : i32
    %c9216_i32_52 = arith.constant 9216 : i32
    %64 = arith.addi %0, %c9216_i32_52 : i32
    %c12096_i32_53 = arith.constant 12096 : i32
    %65 = arith.cmpi sgt, %64, %c12096_i32_53 : i32
    %66 = arith.andi %63, %65 : i1
    %true_54 = arith.constant true
    %67 = arith.xori %62, %true_54 : i1
    %68 = arith.andi %66, %67 : i1
    %cst_55 = arith.constant -3.355000e+02 : f32
    %69 = arith.addf %2, %cst_55 : f32
    %70 = arith.extui %62 : i1 to i32
    %cst_56 = arith.constant 5.000000e-01 : f32
    %cst_57 = arith.constant 2.000000e+00 : f32
    %cst_58 = arith.constant 6.400000e+01 : f32
    %c0_i32_59 = arith.constant 0 : i32
    %71 = arith.cmpi ne, %70, %c0_i32_59 : i32
    scf.if %71 {
      %89 = vector.broadcast %69 : f32 to vector<72x128xf32>
      %90 = arith.addf %8, %89 : vector<72x128xf32>
      %91 = vector.broadcast %cst_56 : f32 to vector<72x128xf32>
      %92 = arith.mulf %90, %91 : vector<72x128xf32>
      %93 = math.floor %92 : vector<72x128xf32>
      %94 = vector.broadcast %cst_57 : f32 to vector<72x128xf32>
      %95 = arith.mulf %93, %94 : vector<72x128xf32>
      %96 = arith.subf %90, %95 : vector<72x128xf32>
      %97 = arith.select %7, %93, %96 : vector<72x128xi1>, vector<72x128xf32>
      %98 = arith.addf %97, %9 : vector<72x128xf32>
      %99 = vector.broadcast %cst_58 : f32 to vector<72x128xf32>
      %100 = arith.mulf %98, %99 : vector<72x128xf32>
      %c0_80 = arith.constant 0 : index
      %c0_81 = arith.constant 0 : index
      %101 = vector.load %arg3[%c0_80, %c0_81] : memref<72x128xf32, #tpu.memory_space<vmem>>, vector<72x128xf32>
      tpu.vector_store %arg3[%c0_80, %c0_81], %100 {strides = array<i32>} : memref<72x128xf32, #tpu.memory_space<vmem>>, vector<72x128xf32>,
    } else {
    }
    %72 = arith.extui %68 : i1 to i32
    %cst_60 = arith.constant 5.000000e-01 : f32
    %cst_61 = arith.constant 2.000000e+00 : f32
    %cst_62 = arith.constant 6.400000e+01 : f32
    %c0_i32_63 = arith.constant 0 : i32
    %73 = arith.cmpi ne, %72, %c0_i32_63 : i32
    scf.if %73 {
      %89 = vector.broadcast %69 : f32 to vector<72x128xf32>
      %90 = arith.addf %8, %89 : vector<72x128xf32>
      %91 = vector.broadcast %cst_60 : f32 to vector<72x128xf32>
      %92 = arith.mulf %90, %91 : vector<72x128xf32>
      %93 = math.floor %92 : vector<72x128xf32>
      %94 = vector.broadcast %cst_61 : f32 to vector<72x128xf32>
      %95 = arith.mulf %93, %94 : vector<72x128xf32>
      %96 = arith.subf %90, %95 : vector<72x128xf32>
      %97 = arith.select %7, %93, %96 : vector<72x128xi1>, vector<72x128xf32>
      %98 = arith.addf %97, %9 : vector<72x128xf32>
      %99 = vector.broadcast %cst_62 : f32 to vector<72x128xf32>
      %100 = arith.mulf %98, %99 : vector<72x128xf32>
      %cst_80 = arith.constant 5.000000e-01 : f32
      %101 = vector.broadcast %cst_80 : f32 to vector<72x128xf32>
      %102 = arith.cmpf oge, %90, %101 : vector<72x128xf32>
      %cst_81 = arith.constant 4.500000e+00 : f32
      %103 = vector.broadcast %cst_81 : f32 to vector<72x128xf32>
      %104 = arith.cmpf olt, %90, %103 : vector<72x128xf32>
      %105 = arith.andi %102, %104 : vector<72x128xi1>
      %c0_82 = arith.constant 0 : index
      %c0_83 = arith.constant 0 : index
      %106 = vector.load %arg3[%c0_82, %c0_83] : memref<72x128xf32, #tpu.memory_space<vmem>>, vector<72x128xf32>
      %107 = arith.select %105, %100, %106 : vector<72x128xi1>, vector<72x128xf32>
      %c0_84 = arith.constant 0 : index
      %c0_85 = arith.constant 0 : index
      %108 = vector.load %arg3[%c0_84, %c0_85] : memref<72x128xf32, #tpu.memory_space<vmem>>, vector<72x128xf32>
      tpu.vector_store %arg3[%c0_84, %c0_85], %107 {strides = array<i32>} : memref<72x128xf32, #tpu.memory_space<vmem>>, vector<72x128xf32>,
    } else {
    }
    %c12240_i32_64 = arith.constant 12240 : i32
    %74 = arith.cmpi sge, %0, %c12240_i32_64 : i32
    %c9216_i32_65 = arith.constant 9216 : i32
    %75 = arith.addi %0, %c9216_i32_65 : i32
    %c12276_i32_66 = arith.constant 12276 : i32
    %76 = arith.cmpi sle, %75, %c12276_i32_66 : i32
    %77 = arith.andi %74, %76 : i1
    %c12276_i32_67 = arith.constant 12276 : i32
    %78 = arith.cmpi slt, %0, %c12276_i32_67 : i32
    %c9216_i32_68 = arith.constant 9216 : i32
    %79 = arith.addi %0, %c9216_i32_68 : i32
    %c12240_i32_69 = arith.constant 12240 : i32
    %80 = arith.cmpi sgt, %79, %c12240_i32_69 : i32
    %81 = arith.andi %78, %80 : i1
    %true_70 = arith.constant true
    %82 = arith.xori %77, %true_70 : i1
    %83 = arith.andi %81, %82 : i1
    %cst_71 = arith.constant -3.395000e+02 : f32
    %84 = arith.addf %2, %cst_71 : f32
    %85 = arith.extui %77 : i1 to i32
    %cst_72 = arith.constant 1.000000e+00 : f32
    %cst_73 = arith.constant 1.000000e+00 : f32
    %cst_74 = arith.constant 1.280000e+02 : f32
    %c0_i32_75 = arith.constant 0 : i32
    %86 = arith.cmpi ne, %85, %c0_i32_75 : i32
    scf.if %86 {
      %89 = vector.broadcast %84 : f32 to vector<72x128xf32>
      %90 = arith.addf %8, %89 : vector<72x128xf32>
      %91 = vector.broadcast %cst_72 : f32 to vector<72x128xf32>
      %92 = arith.mulf %90, %91 : vector<72x128xf32>
      %93 = math.floor %92 : vector<72x128xf32>
      %94 = vector.broadcast %cst_73 : f32 to vector<72x128xf32>
      %95 = arith.mulf %93, %94 : vector<72x128xf32>
      %96 = arith.subf %90, %95 : vector<72x128xf32>
      %97 = arith.select %7, %93, %96 : vector<72x128xi1>, vector<72x128xf32>
      %98 = arith.addf %97, %9 : vector<72x128xf32>
      %99 = vector.broadcast %cst_74 : f32 to vector<72x128xf32>
      %100 = arith.mulf %98, %99 : vector<72x128xf32>
      %c0_80 = arith.constant 0 : index
      %c0_81 = arith.constant 0 : index
      %101 = vector.load %arg3[%c0_80, %c0_81] : memref<72x128xf32, #tpu.memory_space<vmem>>, vector<72x128xf32>
      tpu.vector_store %arg3[%c0_80, %c0_81], %100 {strides = array<i32>} : memref<72x128xf32, #tpu.memory_space<vmem>>, vector<72x128xf32>,
    } else {
    }
    %87 = arith.extui %83 : i1 to i32
    %cst_76 = arith.constant 1.000000e+00 : f32
    %cst_77 = arith.constant 1.000000e+00 : f32
    %cst_78 = arith.constant 1.280000e+02 : f32
    %c0_i32_79 = arith.constant 0 : i32
    %88 = arith.cmpi ne, %87, %c0_i32_79 : i32
    scf.if %88 {
      %89 = vector.broadcast %84 : f32 to vector<72x128xf32>
      %90 = arith.addf %8, %89 : vector<72x128xf32>
      %91 = vector.broadcast %cst_76 : f32 to vector<72x128xf32>
      %92 = arith.mulf %90, %91 : vector<72x128xf32>
      %93 = math.floor %92 : vector<72x128xf32>
      %94 = vector.broadcast %cst_77 : f32 to vector<72x128xf32>
      %95 = arith.mulf %93, %94 : vector<72x128xf32>
      %96 = arith.subf %90, %95 : vector<72x128xf32>
      %97 = arith.select %7, %93, %96 : vector<72x128xi1>, vector<72x128xf32>
      %98 = arith.addf %97, %9 : vector<72x128xf32>
      %99 = vector.broadcast %cst_78 : f32 to vector<72x128xf32>
      %100 = arith.mulf %98, %99 : vector<72x128xf32>
      %cst_80 = arith.constant 5.000000e-01 : f32
      %101 = vector.broadcast %cst_80 : f32 to vector<72x128xf32>
      %102 = arith.cmpf oge, %90, %101 : vector<72x128xf32>
      %cst_81 = arith.constant 1.500000e+00 : f32
      %103 = vector.broadcast %cst_81 : f32 to vector<72x128xf32>
      %104 = arith.cmpf olt, %90, %103 : vector<72x128xf32>
      %105 = arith.andi %102, %104 : vector<72x128xi1>
      %c0_82 = arith.constant 0 : index
      %c0_83 = arith.constant 0 : index
      %106 = vector.load %arg3[%c0_82, %c0_83] : memref<72x128xf32, #tpu.memory_space<vmem>>, vector<72x128xf32>
      %107 = arith.select %105, %100, %106 : vector<72x128xi1>, vector<72x128xf32>
      %c0_84 = arith.constant 0 : index
      %c0_85 = arith.constant 0 : index
      %108 = vector.load %arg3[%c0_84, %c0_85] : memref<72x128xf32, #tpu.memory_space<vmem>>, vector<72x128xf32>
      tpu.vector_store %arg3[%c0_84, %c0_85], %107 {strides = array<i32>} : memref<72x128xf32, #tpu.memory_space<vmem>>, vector<72x128xf32>,
    } else {
    }
    return
  }
  func.func @transform_0(%arg0: i32) -> (i32, i32) {
    %c0_i32 = arith.constant 0 : i32
    %c0_i32_0 = arith.constant 0 : i32
    %c0_i32_1 = arith.constant 0 : i32
    return %c0_i32, %c0_i32_0 : i32, i32
  }
  func.func @transform_1(%arg0: i32) -> (i32, i32) {
    %c0_i32 = arith.constant 0 : i32
    %c0_i32_0 = arith.constant 0 : i32
    %c0_i32_1 = arith.constant 0 : i32
    return %c0_i32, %c0_i32_0 : i32, i32
  }
  func.func @transform_2(%arg0: i32) -> (i32, i32) {
    %c0_i32 = arith.constant 0 : i32
    %c0_i32_0 = arith.constant 0 : i32
    return %arg0, %c0_i32 : i32, i32
  }
}

</mosaic_0001>

<bundles_post_ra>
// kernel: tpu_custom_call.1
= control target key start
LH: loop header
LB: loop body
LE: loop exit
PB: predicated region body
PF: predicated region fallthrough
CT: control target
= control target key end

     0   :  { %7 = vsyncpa [#allocation3], 0  ;;  %s2859_s0 = inlined_call_operand.hbm [shape: f32[72,128], index: 0, kind: input, shape index: {}]   ;;  %s2860_s1 = inlined_call_operand.hbm [shape: f32[72,128], index: 1, kind: input, shape index: {}]   ;;  %s2861_s2 = inlined_call_operand.hbm [shape: f32[144,128], index: 2, kind: output, shape index: {}]  }
   0x1   :  { %8 = vsyncpa [#allocation6], 0 }
   0x2   :  { %9 = vsyncpa [#allocation4], 0 }
   0x3   :  { %11 = vsyncpa [#allocation4 + $0x1], 0  ;;  %s1597_s9 = smov 0   ;;  %s1599_s10 = smov 0  }
   0x4   :  { %s1601_s11 = smov 0   ;;  %s1603_s12 = smov 0  }
   0x5 LB: > { %s1618_s13 = sadd.s32 4294967295, %s1572_s12   ;;  %s1367_s14 = sadd.s32 4294967294, %s1572_s12   ;;  %s1572_s12 = sphi %s1603_s12, %s2938_s12   ;;  %s1568_s11 = sphi %s1601_s11, %s2937_s11   ;;  %s1564_s10 = sphi %s1599_s10, %s2936_s10   ;;  %s1560_s9 = sphi %s1597_s9, %s2935_s9  }
   0x6   : > { %s1622_s15 = sadd.s32 1, %s1572_s12   ;;  %s66_s16 = sadd.s32 1, %s1568_s11 }
   0x7   : > { %s63_s17 = ssub.s32 %s1572_s12, %s1622_s15  ;;  %p76_p0 = scmp.ne.s32.totalorder %s1568_s11, %s1564_s10 }
   0x8   : > { %p64_p1 = scmp.eq.s32.totalorder %s63_s17, 0  ;;  %p77_p2 = scmp.eq.s32.totalorder %s1618_s13, 1 }
   0x9   : > { %p82_p3 = scmp.ne.s32.totalorder %s1564_s10, %s1560_s9  ;;  %p83_p4 = scmp.eq.s32.totalorder %s1367_s14, 1 }
   0xa   : > { %s1633_s18 = scalar_select %p64_p1, %s1568_s11, %s66_s16  }
   0xb   : > { %p1635_p5 = por %p77_p2, %p76_p0  ;;  %p1639_p6 = por %p83_p4, %p82_p3 }
   0xc   : > { %p1368_p7 = scmp.ge.s32.totalorder %s1572_s12, 1  ;;  %p90_p8 = scmp.lt.s32.totalorder %s1572_s12, 3 }
   0xd   : > { %s2865_s19 = scalar_select %p1635_p5, 1, 0 }
   0xe   : > { %s2866_s20 = scalar_select %p1639_p6, 1, 0 }
   0xf   : > { %p2862_p9 = scmp.eq.s32.totalorder %s1618_s13, 0  ;;  %p1646_p10 = pnand %p1368_p7, %p90_p8 }
  0x10   : > { %s1574_s22 = smov [#allocation2]   ;;  %s1575_s25 = smov [#allocation5]  }
  0x11   : > { %s2867_s21 = scalar_select %p1646_p10, 1, 0 }
  0x12   : > { %s102_s23 = sshll.u32 %s1574_s22, 4  ;;  %p1391_p11 = pneg %p1646_p10  ;;  %s103_s23 = int_to_ptr.vmem [resolvable:$true] %s102_s23 }
  0x13   : > { %s115_s26 = sshll.u32 %s1575_s25, 4  ;;  %s1446_s29 = scalar_lea.hbm %s2859_s0, 1152  ;;  %s1658_s26 = int_to_ptr.vmem [resolvable:$true] %s115_s26 }
  0x14   : > { %p1654_p12 = pnand %p2862_p9, %p1391_p11  ;;  %p1447_p13 = scmp.ne.s32.totalorder %s2859_s0, %s1446_s29 }
  0x15   : > { %p1453_p3 = scmp.lt.u32.totalorder %s1446_s29, %s2859_s0 }
  0x16   : > { %p1448_p0 = pneg %p1654_p12 }
  0x18   : > { %p1449_p1 = pnand %p1448_p0, %p1447_p13 }
  0x1a   : > { %p1450_p2 = pneg %p1449_p1 }
  0x1c   : > { %p1455_p4 = pnand %p1453_p3, %p1450_p2 }
  0x1e   : > { %1458 = shalt.err (!%p1455_p4)
}
  0x1f   : > { %s1459_s6 = scalar_lea.vmem %s103_s23, 1152  ;;  %p1467_p9 = scmp.lt.s32.totalorder %s103_s23, %s103_s23 }
  0x20   : > { %p1460_p7 = scmp.ne.s32.totalorder %s103_s23, %s1459_s6  ;;  %p1468_p6 = scmp.lt.s32.totalorder %s1459_s6, %s1459_s6 }
  0x22   : > { %p1462_p8 = pnand %p1460_p7, %p1448_p0  ;;  %p1469_p5 = por %p1468_p6, %p1467_p9 }
  0x24   : > { %p1463_p11 = pneg %p1462_p8 }
  0x26   : > { %p1470_p10 = pnand %p1469_p5, %p1463_p11 }
  0x28   : > { %1473 = shalt.err (!%p1470_p10)
}
  0x29   : > { %s1576_s7 = smov 128   ;;  %s1577_s8 = smov 8  }
  0x2a   : > { %1394 = dma.hbm_to_vmem [thread:$0]  (!%p1654_p12), %s2859_s0, 1152, %s103_s23, [#allocation3], %s1576_s7, %s1576_s7, %s1577_s8  }
  0x2b   : > { %s1474_s25 = scalar_lea.hbm %s2860_s1, 1152 }
  0x2c   : > { %p1475_p13 = scmp.ne.s32.totalorder %s2860_s1, %s1474_s25  ;;  %p1481_p9 = scmp.lt.u32.totalorder %s1474_s25, %s2860_s1 }
  0x2e   : > { %p1477_p5 = pnand %p1475_p13, %p1448_p0 }
  0x30   : > { %p1478_p6 = pneg %p1477_p5 }
  0x32   : > { %p1483_p10 = pnand %p1481_p9, %p1478_p6 }
  0x34   : > { %1486 = shalt.err (!%p1483_p10)
}
  0x35   : > { %s1487_s23 = scalar_lea.vmem %s1658_s26, 1152  ;;  %p1495_p4 = scmp.lt.s32.totalorder %s1658_s26, %s1658_s26 }
  0x36   : > { %p1488_p1 = scmp.ne.s32.totalorder %s1658_s26, %s1487_s23  ;;  %p1496_p7 = scmp.lt.s32.totalorder %s1487_s23, %s1487_s23 }
  0x38   : > { %p1490_p2 = pnand %p1488_p1, %p1448_p0  ;;  %p1497_p8 = por %p1496_p7, %p1495_p4 }
  0x3a   : > { %p1491_p3 = pneg %p1490_p2 }
  0x3c   : > { %p1498_p11 = pnand %p1497_p8, %p1491_p3 }
  0x3e   : > { %1501 = shalt.err (!%p1498_p11)
}
  0x3f   : > { %1397 = dma.hbm_to_vmem [thread:$0]  (!%p1654_p12), %s2860_s1, 1152, %s1658_s26, [#allocation6], %s1576_s7, %s1576_s7, %s1577_s8  }
  0x40   : > { %p2869_p13 = scmp.ne.s32.totalorder %s2867_s21, 0 }
  0x41   : > { %p2870_p5 = scmp.eq.s32.totalorder (!%p2869_p13), %s1618_s13, 0 }
  0x42   : > { %131 = sbr.rel (%p2869_p13) target bundleno = 459 (0x1cb), region = 28 }
  0x49   : > { %1547 = dma.done.wait (%p2870_p5), [#allocation3], 1152   ;;  %p2871_p0 = pmov %p2870_p5 }
  0x4b   : > { %1549 = vsyncadd (%p2871_p0), [#allocation3], 4294966144  ;;  %p2872_p6 = pmov %p2871_p0 }
  0x4c   : > { %p2873_p9 = pmov %p2871_p0 }
  0x4d   : > { %1551 = dma.done.wait (%p2872_p6), [#allocation6], 1152  }
  0x4e   : > { %1553 = vsyncadd (%p2873_p9), [#allocation6], 4294966144  ;;  %s149_s24 = sand.u32 1, %s1564_s10   ;;  %s1719_s26 = smul.u32 9216, %s1618_s13  ;;  %v156_v0 = vlaneseq  ;;  %v1733_v4 = vld [vmem:[#allocation5] sm:$0xff]  ;;  %v1735_v5 = vld [vmem:[#allocation5 + $0x8] sm:$0xff] }
  0x4f   : > { %s1380_s21 = smul.u32 72, %s149_s24  ;;  %s1374_s5 = sshll.u32 %s1618_s13, 8  ;;  %v1737_v6 = vld [vmem:[#allocation5 + $0x10] sm:$0xff]  ;;  %v1739_v7 = vld [vmem:[#allocation5 + $0x18] sm:$0xff]  ;;  %v1741_v8 = vld [vmem:[#allocation5 + $0x20] sm:$0xff] }
  0x50   : > { %s1724_s6 = scvt.s32.f32 %s1374_s5  ;;  %v157_v1 = vand.u32 127, %v156_v0  ;;  %s1727_s7 = sadd.s32 9216, %s1719_s26  ;;  %v1743_v9 = vld [vmem:[#allocation5 + $0x28] sm:$0xff]  ;;  %v1745_v10 = vld [vmem:[#allocation5 + $0x30] sm:$0xff]  ;;  %v1747_v11 = vld [vmem:[#allocation5 + $0x38] sm:$0xff] }
  0x51   : > { %v1749_v12 = vld [vmem:[#allocation5 + $0x40] sm:$0xff]  ;;  %v1751_v13 = vld [vmem:[#allocation2] sm:$0xff]  ;;  %v1755_v15 = vld [vmem:[#allocation2 + $0x10] sm:$0xff]  ;;  %s1769_s8 = scalar_lea.vmem [#allocation7], %s1380_s21  ;;  %p1375_p12 = scmp.le.s32.totalorder %s1727_s7, 12276 }
  0x52   : > { %v158_v2 = vand.u32 1, %v157_v1  ;;  %v1753_v14 = vld [vmem:[#allocation2 + $0x8] sm:$0xff]  ;;  %v1757_v16 = vld [vmem:[#allocation2 + $0x18] sm:$0xff]  ;;  %v1759_v17 = vld [vmem:[#allocation2 + $0x20] sm:$0xff]  ;;  %v1578_v22 = vmov (!%p1375_p12), 0.0  }
  0x53   : > { %v1761_v18 = vld [vmem:[#allocation2 + $0x28] sm:$0xff]  ;;  %v1763_v19 = vld [vmem:[#allocation2 + $0x30] sm:$0xff]  ;;  %v1765_v20 = vld [vmem:[#allocation2 + $0x38] sm:$0xff]  ;;  %182 = sbr.rel (%p1375_p12) target bundleno = 90 (0x5a), region = 40  ;;  %183 = vst [vmem:[%s1769_s8] sm:$0xff] (!%p1375_p12), %v1578_v22 }
  0x54   : > { %vm1729_vm0 = vcmp.eq.s32.totalorder %v158_v2, 0  ;;  %v1767_v21 = vld [vmem:[#allocation2 + $0x40] sm:$0xff]  ;;  %184 = vst [vmem:[%s1769_s8 + $0x8] sm:$0xff] (!%p1375_p12), %v1578_v22  ;;  %185 = vst [vmem:[%s1769_s8 + $0x10] sm:$0xff] (!%p1375_p12), %v1578_v22 }
  0x55   : > { %186 = vst [vmem:[%s1769_s8 + $0x18] sm:$0xff] (!%p1375_p12), %v1578_v22  ;;  %187 = vst [vmem:[%s1769_s8 + $0x20] sm:$0xff] (!%p1375_p12), %v1578_v22 }
  0x56   : > { %188 = vst [vmem:[%s1769_s8 + $0x28] sm:$0xff] (!%p1375_p12), %v1578_v22  ;;  %189 = vst [vmem:[%s1769_s8 + $0x30] sm:$0xff] (!%p1375_p12), %v1578_v22 }
  0x57   : > { %190 = vst [vmem:[%s1769_s8 + $0x38] sm:$0xff] (!%p1375_p12), %v1578_v22  ;;  %191 = vst [vmem:[%s1769_s8 + $0x40] sm:$0xff] (!%p1375_p12), %v1578_v22 }
  0x5a PF: > { %p192_p10 = scmp.ge.s32.totalorder %s1719_s26, 0  ;;  %p193_p1 = scmp.le.s32.totalorder %s1727_s7, 9216 }
  0x5b   : > { %p196_p2 = scmp.lt.s32.totalorder %s1719_s26, 9216  ;;  %p197_p3 = scmp.gt.s32.totalorder %s1727_s7, 0 }
  0x5c   : > { %s203_s14 = sadd.f32 0.5, %s1724_s6  ;;  %p194_p4 = pnand %p193_p1, %p192_p10 }
  0x5d   : > { %p198_p7 = pnand %p197_p3, %p196_p2 }
  0x5e   : > { %205 = sbr.rel (%p194_p4) target bundleno = 126 (0x7e), region = 44  ;;  %v1794_v23 = vstv (!%p194_p4), %s203_s14 }
  0x5f   : > { %p199_p8 = pneg %p198_p7  ;;  %v207_v24 = vadd.f32 (!%p194_p4), %v1794_v23, %v1733_v4  ;;  %v208_v25 = vadd.f32 (!%p194_p4), %v1794_v23, %v1735_v5  ;;  %v209_v26 = vadd.f32 (!%p194_p4), %v1794_v23, %v1737_v6  ;;  %v210_v27 = vadd.f32 (!%p194_p4), %v1794_v23, %v1739_v7 }
  0x60   : > { %v211_v28 = vadd.f32 (!%p194_p4), %v1794_v23, %v1741_v8  ;;  %v212_v29 = vadd.f32 (!%p194_p4), %v1794_v23, %v1743_v9  ;;  %v213_v30 = vadd.f32 (!%p194_p4), %v1794_v23, %v1745_v10  ;;  %v214_v31 = vadd.f32 (!%p194_p4), %v1794_v23, %v1747_v11 }
  0x61   : > { %p1788_p11 = pnand %p199_p8, %p194_p4  ;;  %v216_v32 = vmul.f32 (!%p194_p4), 0.0625, %v207_v24  ;;  %v217_v33 = vmul.f32 (!%p194_p4), 0.0625, %v208_v25  ;;  %v218_v34 = vmul.f32 (!%p194_p4), 0.0625, %v209_v26  ;;  %v219_v35 = vmul.f32 (!%p194_p4), 0.0625, %v210_v27 }
  0x62   : > { %v220_v36 = vmul.f32 (!%p194_p4), 0.0625, %v211_v28  ;;  %v221_v37 = vmul.f32 (!%p194_p4), 0.0625, %v212_v29  ;;  %v222_v38 = vmul.f32 (!%p194_p4), 0.0625, %v213_v30  ;;  %v223_v39 = vmul.f32 (!%p194_p4), 0.0625, %v214_v31 }
  0x63   : > { %v225_v40 = vfloor.f32 (!%p194_p4), %v216_v32  ;;  %v226_v41 = vfloor.f32 (!%p194_p4), %v217_v33  ;;  %v227_v42 = vfloor.f32 (!%p194_p4), %v218_v34  ;;  %v228_v43 = vfloor.f32 (!%p194_p4), %v219_v35 }
  0x64   : > { %v229_v44 = vfloor.f32 (!%p194_p4), %v220_v36  ;;  %v230_v45 = vfloor.f32 (!%p194_p4), %v221_v37  ;;  %v231_v46 = vfloor.f32 (!%p194_p4), %v222_v38  ;;  %v232_v47 = vfloor.f32 (!%p194_p4), %v223_v39 }
  0x65   : > { %v234_v48 = vmul.f32 16.0, %v225_v40  ;;  %v235_v49 = vmul.f32 16.0, %v226_v41  ;;  %v236_v50 = vmul.f32 16.0, %v227_v42  ;;  %v237_v51 = vmul.f32 16.0, %v228_v43 }
  0x66   : > { %v238_v52 = vmul.f32 16.0, %v229_v44  ;;  %v239_v53 = vmul.f32 16.0, %v230_v45  ;;  %v240_v54 = vmul.f32 16.0, %v231_v46  ;;  %v241_v55 = vmul.f32 16.0, %v232_v47 }
  0x67   : > { %v243_v56 = vsub.f32 %v207_v24, %v234_v48  ;;  %v244_v57 = vsub.f32 %v208_v25, %v235_v49  ;;  %v245_v58 = vsub.f32 %v209_v26, %v236_v50  ;;  %v246_v59 = vsub.f32 %v210_v27, %v237_v51 }
  0x68   : > { %v247_v60 = vsub.f32 %v211_v28, %v238_v52  ;;  %v248_v61 = vsub.f32 %v212_v29, %v239_v53  ;;  %v249_v62 = vsub.f32 %v213_v30, %v240_v54  ;;  %v250_v63 = vsub.f32 %v214_v31, %v241_v55 }
  0x69   : > { %v252_v0 = vsel %vm1729_vm0, %v225_v40, %v243_v56  ;;  %v253_v1 = vsel %vm1729_vm0, %v226_v41, %v244_v57  ;;  %v254_v2 = vsel %vm1729_vm0, %v227_v42, %v245_v58  ;;  %v255_v22 = vsel %vm1729_vm0, %v228_v43, %v246_v59 }
  0x6a   : > { %v261_v24 = vadd.f32 %v252_v0, %v1751_v13  ;;  %v262_v25 = vadd.f32 %v253_v1, %v1753_v14  ;;  %v263_v26 = vadd.f32 %v254_v2, %v1755_v15  ;;  %v264_v27 = vadd.f32 %v255_v22, %v1757_v16 }
  0x6b   : > { %v256_v28 = vsel %vm1729_vm0, %v229_v44, %v247_v60  ;;  %v257_v29 = vsel %vm1729_vm0, %v230_v45, %v248_v61  ;;  %v258_v30 = vsel %vm1729_vm0, %v231_v46, %v249_v62  ;;  %v259_v31 = vsel %vm1729_vm0, %v232_v47, %v250_v63 }
  0x6c   : > { %v270_v32 = vmul.f32 8.0, %v261_v24  ;;  %v271_v33 = vmul.f32 8.0, %v262_v25  ;;  %v272_v34 = vmul.f32 8.0, %v263_v26  ;;  %v273_v35 = vmul.f32 8.0, %v264_v27 }
  0x6d   : > { %v265_v36 = vadd.f32 %v256_v28, %v1759_v17  ;;  %v266_v37 = vadd.f32 %v257_v29, %v1761_v18  ;;  %v267_v38 = vadd.f32 %v258_v30, %v1763_v19  ;;  %v268_v39 = vadd.f32 %v259_v31, %v1765_v20 }
  0x6e   : > { %279 = vst [vmem:[%s1769_s8] sm:$0xff] %v270_v32  ;;  %280 = vst [vmem:[%s1769_s8 + $0x8] sm:$0xff] %v271_v33  ;;  %v215_v40 = vadd.f32 %v1794_v23, %v1749_v12 }
  0x6f   : > { %281 = vst [vmem:[%s1769_s8 + $0x10] sm:$0xff] %v272_v34  ;;  %282 = vst [vmem:[%s1769_s8 + $0x18] sm:$0xff] %v273_v35  ;;  %v274_v41 = vmul.f32 8.0, %v265_v36  ;;  %v275_v42 = vmul.f32 8.0, %v266_v37  ;;  %v276_v43 = vmul.f32 8.0, %v267_v38  ;;  %v277_v44 = vmul.f32 8.0, %v268_v39 }
  0x70   : > { %v224_v45 = vmul.f32 0.0625, %v215_v40 }
  0x71   : > { %283 = vst [vmem:[%s1769_s8 + $0x20] sm:$0xff] %v274_v41  ;;  %284 = vst [vmem:[%s1769_s8 + $0x28] sm:$0xff] %v275_v42 }
  0x72   : > { %285 = vst [vmem:[%s1769_s8 + $0x30] sm:$0xff] %v276_v43  ;;  %286 = vst [vmem:[%s1769_s8 + $0x38] sm:$0xff] %v277_v44  ;;  %v233_v46 = vfloor.f32 %v224_v45 }
  0x74   : > { %v242_v47 = vmul.f32 16.0, %v233_v46 }
  0x76   : > { %v251_v48 = vsub.f32 %v215_v40, %v242_v47 }
  0x78   : > { %v260_v49 = vsel %vm1729_vm0, %v233_v46, %v251_v48 }
  0x79   : > { %v269_v50 = vadd.f32 %v260_v49, %v1767_v21 }
  0x7b   : > { %v278_v51 = vmul.f32 8.0, %v269_v50 }
  0x7d   : > { %287 = vst [vmem:[%s1769_s8 + $0x40] sm:$0xff] %v278_v51 }
  0x7e PF: > { %289 = sbr.rel (%p1788_p11) target bundleno = 162 (0xa2), region = 48  ;;  %v1854_v23 = vstv (!%p1788_p11), %s203_s14  ;;  %v390_v45 = vld [vmem:[%s1769_s8] sm:$0xff] (!%p1788_p11)  ;;  %v391_v47 = vld [vmem:[%s1769_s8 + $0x8] sm:$0xff] (!%p1788_p11) }
  0x7f   : > { %v291_v52 = vadd.f32 (!%p1788_p11), %v1854_v23, %v1733_v4  ;;  %v292_v53 = vadd.f32 (!%p1788_p11), %v1854_v23, %v1735_v5  ;;  %v293_v54 = vadd.f32 (!%p1788_p11), %v1854_v23, %v1737_v6  ;;  %v294_v55 = vadd.f32 (!%p1788_p11), %v1854_v23, %v1739_v7 }
  0x80   : > { %v1866_v56 = vadd.f32 (!%p1788_p11), %v1854_v23, %v1741_v8  ;;  %v1870_v57 = vadd.f32 (!%p1788_p11), %v1854_v23, %v1743_v9  ;;  %v1874_v58 = vadd.f32 (!%p1788_p11), %v1854_v23, %v1745_v10  ;;  %v1878_v59 = vadd.f32 (!%p1788_p11), %v1854_v23, %v1747_v11 }
  0x81   : > { %v300_v60 = vmul.f32 (!%p1788_p11), 0.0625, %v291_v52  ;;  %vm363_vm1 = vcmp.ge.f32.partialorder (!%p1788_p11), %v291_v52, 0.5  ;;  %vm372_vm2 = vcmp.lt.f32.partialorder (!%p1788_p11), %v291_v52, 256.5  ;;  %v301_v61 = vmul.f32 (!%p1788_p11), 0.0625, %v292_v53 }
  0x82   : > { %vm364_vm3 = vcmp.ge.f32.partialorder (!%p1788_p11), %v292_v53, 0.5  ;;  %vm373_vm4 = vcmp.lt.f32.partialorder (!%p1788_p11), %v292_v53, 256.5  ;;  %v302_v62 = vmul.f32 (!%p1788_p11), 0.0625, %v293_v54  ;;  %vm365_vm5 = vcmp.ge.f32.partialorder (!%p1788_p11), %v293_v54, 0.5  ;;  %vm1894_vm13 = vmand (!%p1788_p11), %vm363_vm1, %vm372_vm2 }
  0x83   : > { %v309_v63 = vfloor.f32 (!%p1788_p11), %v300_v60  ;;  %v310_v0 = vfloor.f32 (!%p1788_p11), %v301_v61  ;;  %vm374_vm6 = vcmp.lt.f32.partialorder (!%p1788_p11), %v293_v54, 256.5  ;;  %v303_v1 = vmul.f32 (!%p1788_p11), 0.0625, %v294_v55  ;;  %vm1905_vm14 = vmand (!%p1788_p11), %vm364_vm3, %vm373_vm4 }
  0x84   : > { %v311_v2 = vfloor.f32 (!%p1788_p11), %v302_v62  ;;  %vm366_vm7 = vcmp.ge.f32.partialorder (!%p1788_p11), %v294_v55, 0.5  ;;  %vm375_vm8 = vcmp.lt.f32.partialorder (!%p1788_p11), %v294_v55, 256.5  ;;  %v304_v22 = vmul.f32 (!%p1788_p11), 0.0625, %v1866_v56  ;;  %vm1915_vm15 = vmand (!%p1788_p11), %vm365_vm5, %vm374_vm6 }
  0x85   : > { %v318_v24 = vmul.f32 16.0, %v309_v63  ;;  %v319_v25 = vmul.f32 16.0, %v310_v0  ;;  %v312_v26 = vfloor.f32 %v303_v1  ;;  %vm367_vm9 = vcmp.ge.f32.partialorder %v1866_v56, 0.5  ;;  %vm1925_vm1 = vmand %vm366_vm7, %vm375_vm8 }
  0x86   : > { %v320_v27 = vmul.f32 16.0, %v311_v2  ;;  %v313_v28 = vfloor.f32 %v304_v22  ;;  %vm376_vm10 = vcmp.lt.f32.partialorder %v1866_v56, 256.5  ;;  %v305_v29 = vmul.f32 0.0625, %v1870_v57 }
  0x87   : > { %v327_v30 = vsub.f32 %v291_v52, %v318_v24  ;;  %v328_v31 = vsub.f32 %v292_v53, %v319_v25  ;;  %v321_v32 = vmul.f32 16.0, %v312_v26  ;;  %vm368_vm11 = vcmp.ge.f32.partialorder %v1870_v57, 0.5  ;;  %v392_v53 = vld [vmem:[%s1769_s8 + $0x10] sm:$0xff]  ;;  %vm1940_vm2 = vmand %vm367_vm9, %vm376_vm10 }
  0x88   : > { %v329_v33 = vsub.f32 %v293_v54, %v320_v27  ;;  %v322_v34 = vmul.f32 16.0, %v313_v28  ;;  %v314_v35 = vfloor.f32 %v305_v29  ;;  %vm377_vm12 = vcmp.lt.f32.partialorder %v1870_v57, 256.5  ;;  %v393_v54 = vld [vmem:[%s1769_s8 + $0x18] sm:$0xff] }
  0x89   : > { %v336_v36 = vsel %vm1729_vm0, %v309_v63, %v327_v30  ;;  %v337_v37 = vsel %vm1729_vm0, %v310_v0, %v328_v31  ;;  %v330_v38 = vsub.f32 %v294_v55, %v321_v32  ;;  %v306_v39 = vmul.f32 0.0625, %v1874_v58  ;;  %vm386_vm5 = vmand %vm368_vm11, %vm377_vm12 }
  0x8a   : > { %v345_v40 = vadd.f32 %v336_v36, %v1751_v13  ;;  %v346_v42 = vadd.f32 %v337_v37, %v1753_v14  ;;  %v338_v43 = vsel %vm1729_vm0, %v311_v2, %v329_v33  ;;  %v331_v44 = vsub.f32 %v1866_v56, %v322_v34 }
  0x8b   : > { %v347_v48 = vadd.f32 %v338_v43, %v1755_v15  ;;  %v339_v49 = vsel %vm1729_vm0, %v312_v26, %v330_v38  ;;  %v323_v50 = vmul.f32 16.0, %v314_v35  ;;  %v315_v51 = vfloor.f32 %v306_v39 }
  0x8c   : > { %v354_v52 = vmul.f32 8.0, %v345_v40  ;;  %v355_v60 = vmul.f32 8.0, %v346_v42  ;;  %v348_v62 = vadd.f32 %v339_v49, %v1757_v16  ;;  %v340_v63 = vsel %vm1729_vm0, %v313_v28, %v331_v44  ;;  %v394_v28 = vld [vmem:[%s1769_s8 + $0x20] sm:$0xff]  ;;  %v396_v42 = vld [vmem:[%s1769_s8 + $0x30] sm:$0xff] }
  0x8d   : > { %v356_v0 = vmul.f32 8.0, %v347_v48  ;;  %v349_v2 = vadd.f32 %v340_v63, %v1759_v17  ;;  %v332_v22 = vsub.f32 %v1870_v57, %v323_v50  ;;  %v324_v24 = vmul.f32 16.0, %v315_v51  ;;  %v397_v50 = vld [vmem:[%s1769_s8 + $0x38] sm:$0xff] }
  0x8e   : > { %v399_v25 = vsel %vm1894_vm13, %v354_v52, %v390_v45  ;;  %v400_v26 = vsel %vm1905_vm14, %v355_v60, %v391_v47  ;;  %v357_v27 = vmul.f32 8.0, %v348_v62  ;;  %vm369_vm3 = vcmp.ge.f32.partialorder %v1874_v58, 0.5 }
  0x8f   : > { %408 = vst [vmem:[%s1769_s8] sm:$0xff] %v399_v25  ;;  %409 = vst [vmem:[%s1769_s8 + $0x8] sm:$0xff] %v400_v26  ;;  %v401_v29 = vsel %vm1915_vm15, %v356_v0, %v392_v53  ;;  %v358_v30 = vmul.f32 8.0, %v349_v2  ;;  %v341_v31 = vsel %vm1729_vm0, %v314_v35, %v332_v22  ;;  %v333_v56 = vsub.f32 %v1874_v58, %v324_v24  ;;  %v395_v35 = vld [vmem:[%s1769_s8 + $0x28] sm:$0xff] }
  0x90   : > { %410 = vst [vmem:[%s1769_s8 + $0x10] sm:$0xff] %v401_v29  ;;  %v402_v32 = vsel %vm1925_vm1, %v357_v27, %v393_v54  ;;  %v350_v33 = vadd.f32 %v341_v31, %v1761_v18  ;;  %vm378_vm4 = vcmp.lt.f32.partialorder %v1874_v58, 256.5  ;;  %v307_v34 = vmul.f32 0.0625, %v1878_v59 }
  0x91   : > { %411 = vst [vmem:[%s1769_s8 + $0x18] sm:$0xff] %v402_v32  ;;  %v403_v36 = vsel %vm1940_vm2, %v358_v30, %v394_v28  ;;  %v342_v37 = vsel %vm1729_vm0, %v315_v51, %v333_v56  ;;  %v299_v41 = vadd.f32 %v1854_v23, %v1749_v12  ;;  %vm387_vm6 = vmand %vm369_vm3, %vm378_vm4  ;;  %vm370_vm7 = vcmp.ge.f32.partialorder %v1878_v59, 0.5 }
  0x92   : > { %412 = vst [vmem:[%s1769_s8 + $0x20] sm:$0xff] %v403_v36  ;;  %v359_v38 = vmul.f32 8.0, %v350_v33  ;;  %v351_v39 = vadd.f32 %v342_v37, %v1763_v19  ;;  %v316_v40 = vfloor.f32 %v307_v34  ;;  %vm379_vm8 = vcmp.lt.f32.partialorder %v1878_v59, 256.5 }
  0x93   : > { %v308_v45 = vmul.f32 0.0625, %v299_v41  ;;  %vm388_vm9 = vmand %vm370_vm7, %vm379_vm8  ;;  %vm371_vm10 = vcmp.ge.f32.partialorder %v299_v41, 0.5  ;;  %vm380_vm11 = vcmp.lt.f32.partialorder %v299_v41, 256.5 }
  0x94   : > { %v404_v57 = vsel %vm386_vm5, %v359_v38, %v395_v35  ;;  %v360_v43 = vmul.f32 8.0, %v351_v39  ;;  %v325_v44 = vmul.f32 16.0, %v316_v40  ;;  %vm389_vm12 = vmand %vm371_vm10, %vm380_vm11 }
  0x95   : > { %413 = vst [vmem:[%s1769_s8 + $0x28] sm:$0xff] %v404_v57  ;;  %v317_v48 = vfloor.f32 %v308_v45 }
  0x96   : > { %v405_v46 = vsel %vm387_vm6, %v360_v43, %v396_v42  ;;  %v334_v47 = vsub.f32 %v1878_v59, %v325_v44  ;;  %v398_v59 = vld [vmem:[%s1769_s8 + $0x40] sm:$0xff] }
  0x97   : > { %414 = vst [vmem:[%s1769_s8 + $0x30] sm:$0xff] %v405_v46  ;;  %v326_v58 = vmul.f32 16.0, %v317_v48 }
  0x98   : > { %v343_v23 = vsel %vm1729_vm0, %v316_v40, %v334_v47 }
  0x99   : > { %v352_v49 = vadd.f32 %v343_v23, %v1765_v20  ;;  %v335_v51 = vsub.f32 %v299_v41, %v326_v58 }
  0x9b   : > { %v361_v52 = vmul.f32 8.0, %v352_v49  ;;  %v344_v60 = vsel %vm1729_vm0, %v317_v48, %v335_v51 }
  0x9c   : > { %v353_v53 = vadd.f32 %v344_v60, %v1767_v21 }
  0x9d   : > { %v406_v61 = vsel %vm388_vm9, %v361_v52, %v397_v50 }
  0x9e   : > { %415 = vst [vmem:[%s1769_s8 + $0x38] sm:$0xff] %v406_v61  ;;  %v362_v62 = vmul.f32 8.0, %v353_v53 }
  0xa0   : > { %v407_v63 = vsel %vm389_vm12, %v362_v62, %v398_v59 }
  0xa1   : > { %416 = vst [vmem:[%s1769_s8 + $0x40] sm:$0xff] %v407_v63 }
  0xa2 PF: > { %p417_p13 = scmp.ge.s32.totalorder %s1719_s26, 9216  ;;  %p418_p5 = scmp.le.s32.totalorder %s1727_s7, 11520 }
  0xa3   : > { %p421_p0 = scmp.lt.s32.totalorder %s1719_s26, 11520  ;;  %p422_p6 = scmp.gt.s32.totalorder %s1727_s7, 9216 }
  0xa4   : > { %s428_s17 = sadd.f32 -255.5, %s1724_s6  ;;  %p419_p9 = pnand %p418_p5, %p417_p13 }
  0xa5   : > { %p423_p10 = pnand %p422_p6, %p421_p0 }
  0xa6   : > { %430 = sbr.rel (%p419_p9) target bundleno = 198 (0xc6), region = 52  ;;  %v2002_v0 = vstv (!%p419_p9), %s428_s17 }
  0xa7   : > { %p424_p1 = pneg %p423_p10  ;;  %v432_v1 = vadd.f32 (!%p419_p9), %v2002_v0, %v1733_v4  ;;  %v433_v54 = vadd.f32 (!%p419_p9), %v2002_v0, %v1735_v5  ;;  %v434_v2 = vadd.f32 (!%p419_p9), %v2002_v0, %v1737_v6  ;;  %v435_v22 = vadd.f32 (!%p419_p9), %v2002_v0, %v1739_v7 }
  0xa8   : > { %v436_v24 = vadd.f32 (!%p419_p9), %v2002_v0, %v1741_v8  ;;  %v437_v25 = vadd.f32 (!%p419_p9), %v2002_v0, %v1743_v9  ;;  %v438_v26 = vadd.f32 (!%p419_p9), %v2002_v0, %v1745_v10  ;;  %v439_v27 = vadd.f32 (!%p419_p9), %v2002_v0, %v1747_v11 }
  0xa9   : > { %p1996_p2 = pnand %p424_p1, %p419_p9  ;;  %v441_v55 = vmul.f32 (!%p419_p9), 0.125, %v432_v1  ;;  %v442_v28 = vmul.f32 (!%p419_p9), 0.125, %v433_v54  ;;  %v443_v29 = vmul.f32 (!%p419_p9), 0.125, %v434_v2  ;;  %v444_v30 = vmul.f32 (!%p419_p9), 0.125, %v435_v22 }
  0xaa   : > { %v445_v31 = vmul.f32 (!%p419_p9), 0.125, %v436_v24  ;;  %v446_v56 = vmul.f32 (!%p419_p9), 0.125, %v437_v25  ;;  %v447_v32 = vmul.f32 (!%p419_p9), 0.125, %v438_v26  ;;  %v448_v33 = vmul.f32 (!%p419_p9), 0.125, %v439_v27 }
  0xab   : > { %v450_v34 = vfloor.f32 (!%p419_p9), %v441_v55  ;;  %v451_v36 = vfloor.f32 (!%p419_p9), %v442_v28  ;;  %v452_v35 = vfloor.f32 (!%p419_p9), %v443_v29  ;;  %v453_v37 = vfloor.f32 (!%p419_p9), %v444_v30 }
  0xac   : > { %v454_v38 = vfloor.f32 (!%p419_p9), %v445_v31  ;;  %v455_v39 = vfloor.f32 (!%p419_p9), %v446_v56  ;;  %v456_v40 = vfloor.f32 (!%p419_p9), %v447_v32  ;;  %v457_v41 = vfloor.f32 (!%p419_p9), %v448_v33 }
  0xad   : > { %v459_v42 = vmul.f32 8.0, %v450_v34  ;;  %v460_v57 = vmul.f32 8.0, %v451_v36  ;;  %v461_v43 = vmul.f32 8.0, %v452_v35  ;;  %v462_v44 = vmul.f32 8.0, %v453_v37 }
  0xae   : > { %v463_v45 = vmul.f32 8.0, %v454_v38  ;;  %v464_v46 = vmul.f32 8.0, %v455_v39  ;;  %v465_v47 = vmul.f32 8.0, %v456_v40  ;;  %v466_v48 = vmul.f32 8.0, %v457_v41 }
  0xaf   : > { %v468_v23 = vsub.f32 %v432_v1, %v459_v42  ;;  %v469_v58 = vsub.f32 %v433_v54, %v460_v57  ;;  %v470_v49 = vsub.f32 %v434_v2, %v461_v43  ;;  %v471_v50 = vsub.f32 %v435_v22, %v462_v44 }
  0xb0   : > { %v472_v51 = vsub.f32 %v436_v24, %v463_v45  ;;  %v473_v52 = vsub.f32 %v437_v25, %v464_v46  ;;  %v474_v60 = vsub.f32 %v438_v26, %v465_v47  ;;  %v475_v61 = vsub.f32 %v439_v27, %v466_v48 }
  0xb1   : > { %v477_v53 = vsel %vm1729_vm0, %v450_v34, %v468_v23  ;;  %v478_v59 = vsel %vm1729_vm0, %v451_v36, %v469_v58  ;;  %v479_v62 = vsel %vm1729_vm0, %v452_v35, %v470_v49  ;;  %v480_v63 = vsel %vm1729_vm0, %v453_v37, %v471_v50 }
  0xb2   : > { %v486_v1 = vadd.f32 %v477_v53, %v1751_v13  ;;  %v487_v54 = vadd.f32 %v478_v59, %v1753_v14  ;;  %v488_v2 = vadd.f32 %v479_v62, %v1755_v15  ;;  %v489_v22 = vadd.f32 %v480_v63, %v1757_v16 }
  0xb3   : > { %v481_v24 = vsel %vm1729_vm0, %v454_v38, %v472_v51  ;;  %v482_v25 = vsel %vm1729_vm0, %v455_v39, %v473_v52  ;;  %v483_v26 = vsel %vm1729_vm0, %v456_v40, %v474_v60  ;;  %v484_v27 = vsel %vm1729_vm0, %v457_v41, %v475_v61 }
  0xb4   : > { %v495_v55 = vmul.f32 16.0, %v486_v1  ;;  %v496_v28 = vmul.f32 16.0, %v487_v54  ;;  %v497_v29 = vmul.f32 16.0, %v488_v2  ;;  %v498_v30 = vmul.f32 16.0, %v489_v22 }
  0xb5   : > { %v490_v31 = vadd.f32 %v481_v24, %v1759_v17  ;;  %v491_v56 = vadd.f32 %v482_v25, %v1761_v18  ;;  %v492_v32 = vadd.f32 %v483_v26, %v1763_v19  ;;  %v493_v33 = vadd.f32 %v484_v27, %v1765_v20 }
  0xb6   : > { %504 = vst [vmem:[%s1769_s8] sm:$0xff] %v495_v55  ;;  %505 = vst [vmem:[%s1769_s8 + $0x8] sm:$0xff] %v496_v28  ;;  %v440_v34 = vadd.f32 %v2002_v0, %v1749_v12 }
  0xb7   : > { %506 = vst [vmem:[%s1769_s8 + $0x10] sm:$0xff] %v497_v29  ;;  %507 = vst [vmem:[%s1769_s8 + $0x18] sm:$0xff] %v498_v30  ;;  %v499_v36 = vmul.f32 16.0, %v490_v31  ;;  %v500_v35 = vmul.f32 16.0, %v491_v56  ;;  %v501_v37 = vmul.f32 16.0, %v492_v32  ;;  %v502_v38 = vmul.f32 16.0, %v493_v33 }
  0xb8   : > { %v449_v39 = vmul.f32 0.125, %v440_v34 }
  0xb9   : > { %508 = vst [vmem:[%s1769_s8 + $0x20] sm:$0xff] %v499_v36  ;;  %509 = vst [vmem:[%s1769_s8 + $0x28] sm:$0xff] %v500_v35 }
  0xba   : > { %510 = vst [vmem:[%s1769_s8 + $0x30] sm:$0xff] %v501_v37  ;;  %511 = vst [vmem:[%s1769_s8 + $0x38] sm:$0xff] %v502_v38  ;;  %v458_v40 = vfloor.f32 %v449_v39 }
  0xbc   : > { %v467_v41 = vmul.f32 8.0, %v458_v40 }
  0xbe   : > { %v476_v42 = vsub.f32 %v440_v34, %v467_v41 }
  0xc0   : > { %v485_v57 = vsel %vm1729_vm0, %v458_v40, %v476_v42 }
  0xc1   : > { %v494_v43 = vadd.f32 %v485_v57, %v1767_v21 }
  0xc3   : > { %v503_v44 = vmul.f32 16.0, %v494_v43 }
  0xc5   : > { %512 = vst [vmem:[%s1769_s8 + $0x40] sm:$0xff] %v503_v44 }
  0xc6 PF: > { %514 = sbr.rel (%p1996_p2) target bundleno = 234 (0xea), region = 56  ;;  %v2062_v0 = vstv (!%p1996_p2), %s428_s17  ;;  %v615_v39 = vld [vmem:[%s1769_s8] sm:$0xff] (!%p1996_p2)  ;;  %v616_v41 = vld [vmem:[%s1769_s8 + $0x8] sm:$0xff] (!%p1996_p2) }
  0xc7   : > { %v516_v45 = vadd.f32 (!%p1996_p2), %v2062_v0, %v1733_v4  ;;  %v517_v46 = vadd.f32 (!%p1996_p2), %v2062_v0, %v1735_v5  ;;  %v518_v47 = vadd.f32 (!%p1996_p2), %v2062_v0, %v1737_v6  ;;  %v519_v48 = vadd.f32 (!%p1996_p2), %v2062_v0, %v1739_v7 }
  0xc8   : > { %v2074_v23 = vadd.f32 (!%p1996_p2), %v2062_v0, %v1741_v8  ;;  %v2078_v58 = vadd.f32 (!%p1996_p2), %v2062_v0, %v1743_v9  ;;  %v2082_v49 = vadd.f32 (!%p1996_p2), %v2062_v0, %v1745_v10  ;;  %v2086_v50 = vadd.f32 (!%p1996_p2), %v2062_v0, %v1747_v11 }
  0xc9   : > { %v525_v51 = vmul.f32 (!%p1996_p2), 0.125, %v516_v45  ;;  %vm588_vm13 = vcmp.ge.f32.partialorder (!%p1996_p2), %v516_v45, 0.5  ;;  %vm597_vm14 = vcmp.lt.f32.partialorder (!%p1996_p2), %v516_v45, 64.5  ;;  %v526_v52 = vmul.f32 (!%p1996_p2), 0.125, %v517_v46 }
  0xca   : > { %vm589_vm15 = vcmp.ge.f32.partialorder (!%p1996_p2), %v517_v46, 0.5  ;;  %vm598_vm1 = vcmp.lt.f32.partialorder (!%p1996_p2), %v517_v46, 64.5  ;;  %v527_v60 = vmul.f32 (!%p1996_p2), 0.125, %v518_v47  ;;  %vm590_vm2 = vcmp.ge.f32.partialorder (!%p1996_p2), %v518_v47, 0.5  ;;  %vm2102_vm10 = vmand (!%p1996_p2), %vm588_vm13, %vm597_vm14 }
  0xcb   : > { %v534_v61 = vfloor.f32 (!%p1996_p2), %v525_v51  ;;  %v535_v53 = vfloor.f32 (!%p1996_p2), %v526_v52  ;;  %vm599_vm3 = vcmp.lt.f32.partialorder (!%p1996_p2), %v518_v47, 64.5  ;;  %v528_v59 = vmul.f32 (!%p1996_p2), 0.125, %v519_v48  ;;  %vm2113_vm11 = vmand (!%p1996_p2), %vm589_vm15, %vm598_vm1 }
  0xcc   : > { %v536_v62 = vfloor.f32 (!%p1996_p2), %v527_v60  ;;  %vm591_vm4 = vcmp.ge.f32.partialorder (!%p1996_p2), %v519_v48, 0.5  ;;  %vm600_vm5 = vcmp.lt.f32.partialorder (!%p1996_p2), %v519_v48, 64.5  ;;  %v529_v63 = vmul.f32 (!%p1996_p2), 0.125, %v2074_v23  ;;  %vm2123_vm12 = vmand (!%p1996_p2), %vm590_vm2, %vm599_vm3 }
  0xcd   : > { %v543_v1 = vmul.f32 8.0, %v534_v61  ;;  %v544_v54 = vmul.f32 8.0, %v535_v53  ;;  %v537_v2 = vfloor.f32 %v528_v59  ;;  %vm592_vm6 = vcmp.ge.f32.partialorder %v2074_v23, 0.5  ;;  %vm2133_vm13 = vmand %vm591_vm4, %vm600_vm5 }
  0xce   : > { %v545_v22 = vmul.f32 8.0, %v536_v62  ;;  %v538_v24 = vfloor.f32 %v529_v63  ;;  %vm601_vm7 = vcmp.lt.f32.partialorder %v2074_v23, 64.5  ;;  %v530_v25 = vmul.f32 0.125, %v2078_v58 }
  0xcf   : > { %v552_v26 = vsub.f32 %v516_v45, %v543_v1  ;;  %v553_v27 = vsub.f32 %v517_v46, %v544_v54  ;;  %v546_v55 = vmul.f32 8.0, %v537_v2  ;;  %vm593_vm8 = vcmp.ge.f32.partialorder %v2078_v58, 0.5  ;;  %v617_v46 = vld [vmem:[%s1769_s8 + $0x10] sm:$0xff]  ;;  %vm2148_vm14 = vmand %vm592_vm6, %vm601_vm7 }
  0xd0   : > { %v554_v28 = vsub.f32 %v518_v47, %v545_v22  ;;  %v547_v29 = vmul.f32 8.0, %v538_v24  ;;  %v539_v30 = vfloor.f32 %v530_v25  ;;  %vm602_vm9 = vcmp.lt.f32.partialorder %v2078_v58, 64.5  ;;  %v618_v47 = vld [vmem:[%s1769_s8 + $0x18] sm:$0xff] }
  0xd1   : > { %v561_v31 = vsel %vm1729_vm0, %v534_v61, %v552_v26  ;;  %v562_v56 = vsel %vm1729_vm0, %v535_v53, %v553_v27  ;;  %v555_v32 = vsub.f32 %v519_v48, %v546_v55  ;;  %v531_v33 = vmul.f32 0.125, %v2082_v49  ;;  %vm611_vm2 = vmand %vm593_vm8, %vm602_vm9 }
  0xd2   : > { %v570_v34 = vadd.f32 %v561_v31, %v1751_v13  ;;  %v571_v35 = vadd.f32 %v562_v56, %v1753_v14  ;;  %v563_v37 = vsel %vm1729_vm0, %v536_v62, %v554_v28  ;;  %v556_v38 = vsub.f32 %v2074_v23, %v547_v29 }
  0xd3   : > { %v572_v42 = vadd.f32 %v563_v37, %v1755_v15  ;;  %v564_v57 = vsel %vm1729_vm0, %v537_v2, %v555_v32  ;;  %v548_v43 = vmul.f32 8.0, %v539_v30  ;;  %v540_v44 = vfloor.f32 %v531_v33 }
  0xd4   : > { %v579_v45 = vmul.f32 16.0, %v570_v34  ;;  %v580_v51 = vmul.f32 16.0, %v571_v35  ;;  %v573_v60 = vadd.f32 %v564_v57, %v1757_v16  ;;  %v565_v61 = vsel %vm1729_vm0, %v538_v24, %v556_v38  ;;  %v619_v24 = vld [vmem:[%s1769_s8 + $0x20] sm:$0xff]  ;;  %v621_v35 = vld [vmem:[%s1769_s8 + $0x30] sm:$0xff] }
  0xd5   : > { %v581_v53 = vmul.f32 16.0, %v572_v42  ;;  %v574_v62 = vadd.f32 %v565_v61, %v1759_v17  ;;  %v557_v63 = vsub.f32 %v2078_v58, %v548_v43  ;;  %v549_v1 = vmul.f32 8.0, %v540_v44  ;;  %v622_v43 = vld [vmem:[%s1769_s8 + $0x38] sm:$0xff] }
  0xd6   : > { %v624_v54 = vsel %vm2102_vm10, %v579_v45, %v615_v39  ;;  %v625_v2 = vsel %vm2113_vm11, %v580_v51, %v616_v41  ;;  %v582_v22 = vmul.f32 16.0, %v573_v60  ;;  %vm594_vm15 = vcmp.ge.f32.partialorder %v2082_v49, 0.5 }
  0xd7   : > { %633 = vst [vmem:[%s1769_s8] sm:$0xff] %v624_v54  ;;  %634 = vst [vmem:[%s1769_s8 + $0x8] sm:$0xff] %v625_v2  ;;  %v626_v25 = vsel %vm2123_vm12, %v581_v53, %v617_v46  ;;  %v583_v26 = vmul.f32 16.0, %v574_v62  ;;  %v566_v27 = vsel %vm1729_vm0, %v539_v30, %v557_v63  ;;  %v558_v23 = vsub.f32 %v2082_v49, %v549_v1  ;;  %v620_v30 = vld [vmem:[%s1769_s8 + $0x28] sm:$0xff] }
  0xd8   : > { %635 = vst [vmem:[%s1769_s8 + $0x10] sm:$0xff] %v626_v25  ;;  %v627_v55 = vsel %vm2133_vm13, %v582_v22, %v618_v47  ;;  %v575_v28 = vadd.f32 %v566_v27, %v1761_v18  ;;  %vm603_vm1 = vcmp.lt.f32.partialorder %v2082_v49, 64.5  ;;  %v532_v29 = vmul.f32 0.125, %v2086_v50 }
  0xd9   : > { %636 = vst [vmem:[%s1769_s8 + $0x18] sm:$0xff] %v627_v55  ;;  %v628_v31 = vsel %vm2148_vm14, %v583_v26, %v619_v24  ;;  %v567_v56 = vsel %vm1729_vm0, %v540_v44, %v558_v23  ;;  %v524_v36 = vadd.f32 %v2062_v0, %v1749_v12  ;;  %vm612_vm3 = vmand %vm594_vm15, %vm603_vm1  ;;  %vm595_vm4 = vcmp.ge.f32.partialorder %v2086_v50, 0.5 }
  0xda   : > { %637 = vst [vmem:[%s1769_s8 + $0x20] sm:$0xff] %v628_v31  ;;  %v584_v32 = vmul.f32 16.0, %v575_v28  ;;  %v576_v33 = vadd.f32 %v567_v56, %v1763_v19  ;;  %v541_v34 = vfloor.f32 %v532_v29  ;;  %vm604_vm5 = vcmp.lt.f32.partialorder %v2086_v50, 64.5 }
  0xdb   : > { %v533_v39 = vmul.f32 0.125, %v524_v36  ;;  %vm613_vm6 = vmand %vm595_vm4, %vm604_vm5  ;;  %vm596_vm7 = vcmp.ge.f32.partialorder %v524_v36, 0.5  ;;  %vm605_vm8 = vcmp.lt.f32.partialorder %v524_v36, 64.5 }
  0xdc   : > { %v629_v58 = vsel %vm611_vm2, %v584_v32, %v620_v30  ;;  %v585_v37 = vmul.f32 16.0, %v576_v33  ;;  %v550_v38 = vmul.f32 8.0, %v541_v34  ;;  %vm614_vm9 = vmand %vm596_vm7, %vm605_vm8 }
  0xdd   : > { %638 = vst [vmem:[%s1769_s8 + $0x28] sm:$0xff] %v629_v58  ;;  %v542_v42 = vfloor.f32 %v533_v39 }
  0xde   : > { %v630_v40 = vsel %vm612_vm3, %v585_v37, %v621_v35  ;;  %v559_v41 = vsub.f32 %v2086_v50, %v550_v38  ;;  %v623_v50 = vld [vmem:[%s1769_s8 + $0x40] sm:$0xff] }
  0xdf   : > { %639 = vst [vmem:[%s1769_s8 + $0x30] sm:$0xff] %v630_v40  ;;  %v551_v49 = vmul.f32 8.0, %v542_v42 }
  0xe0   : > { %v568_v0 = vsel %vm1729_vm0, %v541_v34, %v559_v41 }
  0xe1   : > { %v577_v57 = vadd.f32 %v568_v0, %v1765_v20  ;;  %v560_v44 = vsub.f32 %v524_v36, %v551_v49 }
  0xe3   : > { %v586_v45 = vmul.f32 16.0, %v577_v57  ;;  %v569_v51 = vsel %vm1729_vm0, %v542_v42, %v560_v44 }
  0xe4   : > { %v578_v46 = vadd.f32 %v569_v51, %v1767_v21 }
  0xe5   : > { %v631_v52 = vsel %vm613_vm6, %v586_v45, %v622_v43 }
  0xe6   : > { %640 = vst [vmem:[%s1769_s8 + $0x38] sm:$0xff] %v631_v52  ;;  %v587_v60 = vmul.f32 16.0, %v578_v46 }
  0xe8   : > { %v632_v61 = vsel %vm614_vm9, %v587_v60, %v623_v50 }
  0xe9   : > { %641 = vst [vmem:[%s1769_s8 + $0x40] sm:$0xff] %v632_v61 }
  0xea PF: > { %p642_p3 = scmp.ge.s32.totalorder %s1719_s26, 11520  ;;  %p643_p4 = scmp.le.s32.totalorder %s1727_s7, 12096 }
  0xeb   : > { %p646_p7 = scmp.lt.s32.totalorder %s1719_s26, 12096  ;;  %p647_p8 = scmp.gt.s32.totalorder %s1727_s7, 11520 }
  0xec   : > { %s653_s25 = sadd.f32 -319.5, %s1724_s6  ;;  %p644_p11 = pnand %p643_p4, %p642_p3 }
  0xed   : > { %p648_p13 = pnand %p647_p8, %p646_p7 }
  0xee   : > { %655 = sbr.rel (%p644_p11) target bundleno = 270 (0x10e), region = 60  ;;  %v2210_v53 = vstv (!%p644_p11), %s653_s25 }
  0xef   : > { %p649_p5 = pneg %p648_p13  ;;  %v657_v59 = vadd.f32 (!%p644_p11), %v2210_v53, %v1733_v4  ;;  %v658_v47 = vadd.f32 (!%p644_p11), %v2210_v53, %v1735_v5  ;;  %v659_v62 = vadd.f32 (!%p644_p11), %v2210_v53, %v1737_v6  ;;  %v660_v63 = vadd.f32 (!%p644_p11), %v2210_v53, %v1739_v7 }
  0xf0   : > { %v661_v1 = vadd.f32 (!%p644_p11), %v2210_v53, %v1741_v8  ;;  %v662_v54 = vadd.f32 (!%p644_p11), %v2210_v53, %v1743_v9  ;;  %v663_v2 = vadd.f32 (!%p644_p11), %v2210_v53, %v1745_v10  ;;  %v664_v22 = vadd.f32 (!%p644_p11), %v2210_v53, %v1747_v11 }
  0xf1   : > { %p2204_p0 = pnand %p649_p5, %p644_p11  ;;  %v666_v48 = vmul.f32 (!%p644_p11), 0.25, %v657_v59  ;;  %v667_v24 = vmul.f32 (!%p644_p11), 0.25, %v658_v47  ;;  %v668_v25 = vmul.f32 (!%p644_p11), 0.25, %v659_v62  ;;  %v669_v26 = vmul.f32 (!%p644_p11), 0.25, %v660_v63 }
  0xf2   : > { %v670_v27 = vmul.f32 (!%p644_p11), 0.25, %v661_v1  ;;  %v671_v23 = vmul.f32 (!%p644_p11), 0.25, %v662_v54  ;;  %v672_v55 = vmul.f32 (!%p644_p11), 0.25, %v663_v2  ;;  %v673_v28 = vmul.f32 (!%p644_p11), 0.25, %v664_v22 }
  0xf3   : > { %v675_v29 = vfloor.f32 (!%p644_p11), %v666_v48  ;;  %v676_v31 = vfloor.f32 (!%p644_p11), %v667_v24  ;;  %v677_v30 = vfloor.f32 (!%p644_p11), %v668_v25  ;;  %v678_v56 = vfloor.f32 (!%p644_p11), %v669_v26 }
  0xf4   : > { %v679_v32 = vfloor.f32 (!%p644_p11), %v670_v27  ;;  %v680_v33 = vfloor.f32 (!%p644_p11), %v671_v23  ;;  %v681_v34 = vfloor.f32 (!%p644_p11), %v672_v55  ;;  %v682_v36 = vfloor.f32 (!%p644_p11), %v673_v28 }
  0xf5   : > { %v684_v35 = vmul.f32 4.0, %v675_v29  ;;  %v685_v58 = vmul.f32 4.0, %v676_v31  ;;  %v686_v37 = vmul.f32 4.0, %v677_v30  ;;  %v687_v38 = vmul.f32 4.0, %v678_v56 }
  0xf6   : > { %v688_v39 = vmul.f32 4.0, %v679_v32  ;;  %v689_v40 = vmul.f32 4.0, %v680_v33  ;;  %v690_v41 = vmul.f32 4.0, %v681_v34  ;;  %v691_v42 = vmul.f32 4.0, %v682_v36 }
  0xf7   : > { %v693_v0 = vsub.f32 %v657_v59, %v684_v35  ;;  %v694_v49 = vsub.f32 %v658_v47, %v685_v58  ;;  %v695_v57 = vsub.f32 %v659_v62, %v686_v37  ;;  %v696_v43 = vsub.f32 %v660_v63, %v687_v38 }
  0xf8   : > { %v697_v44 = vsub.f32 %v661_v1, %v688_v39  ;;  %v698_v45 = vsub.f32 %v662_v54, %v689_v40  ;;  %v699_v51 = vsub.f32 %v663_v2, %v690_v41  ;;  %v700_v52 = vsub.f32 %v664_v22, %v691_v42 }
  0xf9   : > { %v702_v46 = vsel %vm1729_vm0, %v675_v29, %v693_v0  ;;  %v703_v50 = vsel %vm1729_vm0, %v676_v31, %v694_v49  ;;  %v704_v60 = vsel %vm1729_vm0, %v677_v30, %v695_v57  ;;  %v705_v61 = vsel %vm1729_vm0, %v678_v56, %v696_v43 }
  0xfa   : > { %v711_v59 = vadd.f32 %v702_v46, %v1751_v13  ;;  %v712_v47 = vadd.f32 %v703_v50, %v1753_v14  ;;  %v713_v62 = vadd.f32 %v704_v60, %v1755_v15  ;;  %v714_v63 = vadd.f32 %v705_v61, %v1757_v16 }
  0xfb   : > { %v706_v1 = vsel %vm1729_vm0, %v679_v32, %v697_v44  ;;  %v707_v54 = vsel %vm1729_vm0, %v680_v33, %v698_v45  ;;  %v708_v2 = vsel %vm1729_vm0, %v681_v34, %v699_v51  ;;  %v709_v22 = vsel %vm1729_vm0, %v682_v36, %v700_v52 }
  0xfc   : > { %v720_v48 = vmul.f32 32.0, %v711_v59  ;;  %v721_v24 = vmul.f32 32.0, %v712_v47  ;;  %v722_v25 = vmul.f32 32.0, %v713_v62  ;;  %v723_v26 = vmul.f32 32.0, %v714_v63 }
  0xfd   : > { %v715_v27 = vadd.f32 %v706_v1, %v1759_v17  ;;  %v716_v23 = vadd.f32 %v707_v54, %v1761_v18  ;;  %v717_v55 = vadd.f32 %v708_v2, %v1763_v19  ;;  %v718_v28 = vadd.f32 %v709_v22, %v1765_v20 }
  0xfe   : > { %729 = vst [vmem:[%s1769_s8] sm:$0xff] %v720_v48  ;;  %730 = vst [vmem:[%s1769_s8 + $0x8] sm:$0xff] %v721_v24  ;;  %v665_v29 = vadd.f32 %v2210_v53, %v1749_v12 }
  0xff   : > { %731 = vst [vmem:[%s1769_s8 + $0x10] sm:$0xff] %v722_v25  ;;  %732 = vst [vmem:[%s1769_s8 + $0x18] sm:$0xff] %v723_v26  ;;  %v724_v31 = vmul.f32 32.0, %v715_v27  ;;  %v725_v30 = vmul.f32 32.0, %v716_v23  ;;  %v726_v56 = vmul.f32 32.0, %v717_v55  ;;  %v727_v32 = vmul.f32 32.0, %v718_v28 }
 0x100   : > { %v674_v33 = vmul.f32 0.25, %v665_v29 }
 0x101   : > { %733 = vst [vmem:[%s1769_s8 + $0x20] sm:$0xff] %v724_v31  ;;  %734 = vst [vmem:[%s1769_s8 + $0x28] sm:$0xff] %v725_v30 }
 0x102   : > { %735 = vst [vmem:[%s1769_s8 + $0x30] sm:$0xff] %v726_v56  ;;  %736 = vst [vmem:[%s1769_s8 + $0x38] sm:$0xff] %v727_v32  ;;  %v683_v34 = vfloor.f32 %v674_v33 }
 0x104   : > { %v692_v36 = vmul.f32 4.0, %v683_v34 }
 0x106   : > { %v701_v35 = vsub.f32 %v665_v29, %v692_v36 }
 0x108   : > { %v710_v58 = vsel %vm1729_vm0, %v683_v34, %v701_v35 }
 0x109   : > { %v719_v37 = vadd.f32 %v710_v58, %v1767_v21 }
 0x10b   : > { %v728_v38 = vmul.f32 32.0, %v719_v37 }
 0x10d   : > { %737 = vst [vmem:[%s1769_s8 + $0x40] sm:$0xff] %v728_v38 }
 0x10e PF: > { %739 = sbr.rel (%p2204_p0) target bundleno = 306 (0x132), region = 64  ;;  %v2270_v53 = vstv (!%p2204_p0), %s653_s25  ;;  %v840_v33 = vld [vmem:[%s1769_s8] sm:$0xff] (!%p2204_p0)  ;;  %v841_v36 = vld [vmem:[%s1769_s8 + $0x8] sm:$0xff] (!%p2204_p0) }
 0x10f   : > { %v741_v39 = vadd.f32 (!%p2204_p0), %v2270_v53, %v1733_v4  ;;  %v742_v40 = vadd.f32 (!%p2204_p0), %v2270_v53, %v1735_v5  ;;  %v743_v41 = vadd.f32 (!%p2204_p0), %v2270_v53, %v1737_v6  ;;  %v744_v42 = vadd.f32 (!%p2204_p0), %v2270_v53, %v1739_v7 }
 0x110   : > { %v2282_v0 = vadd.f32 (!%p2204_p0), %v2270_v53, %v1741_v8  ;;  %v2286_v49 = vadd.f32 (!%p2204_p0), %v2270_v53, %v1743_v9  ;;  %v2290_v57 = vadd.f32 (!%p2204_p0), %v2270_v53, %v1745_v10  ;;  %v2294_v43 = vadd.f32 (!%p2204_p0), %v2270_v53, %v1747_v11 }
 0x111   : > { %v750_v44 = vmul.f32 (!%p2204_p0), 0.25, %v741_v39  ;;  %vm813_vm10 = vcmp.ge.f32.partialorder (!%p2204_p0), %v741_v39, 0.5  ;;  %vm822_vm11 = vcmp.lt.f32.partialorder (!%p2204_p0), %v741_v39, 16.5  ;;  %v751_v45 = vmul.f32 (!%p2204_p0), 0.25, %v742_v40 }
 0x112   : > { %vm814_vm12 = vcmp.ge.f32.partialorder (!%p2204_p0), %v742_v40, 0.5  ;;  %vm823_vm13 = vcmp.lt.f32.partialorder (!%p2204_p0), %v742_v40, 16.5  ;;  %v752_v51 = vmul.f32 (!%p2204_p0), 0.25, %v743_v41  ;;  %vm815_vm14 = vcmp.ge.f32.partialorder (!%p2204_p0), %v743_v41, 0.5  ;;  %vm2310_vm7 = vmand (!%p2204_p0), %vm813_vm10, %vm822_vm11 }
 0x113   : > { %v759_v52 = vfloor.f32 (!%p2204_p0), %v750_v44  ;;  %v760_v46 = vfloor.f32 (!%p2204_p0), %v751_v45  ;;  %vm824_vm15 = vcmp.lt.f32.partialorder (!%p2204_p0), %v743_v41, 16.5  ;;  %v753_v50 = vmul.f32 (!%p2204_p0), 0.25, %v744_v42  ;;  %vm2321_vm8 = vmand (!%p2204_p0), %vm814_vm12, %vm823_vm13 }
 0x114   : > { %v761_v60 = vfloor.f32 (!%p2204_p0), %v752_v51  ;;  %vm816_vm1 = vcmp.ge.f32.partialorder (!%p2204_p0), %v744_v42, 0.5  ;;  %vm825_vm2 = vcmp.lt.f32.partialorder (!%p2204_p0), %v744_v42, 16.5  ;;  %v754_v61 = vmul.f32 (!%p2204_p0), 0.25, %v2282_v0  ;;  %vm2331_vm9 = vmand (!%p2204_p0), %vm815_vm14, %vm824_vm15 }
 0x115   : > { %v768_v59 = vmul.f32 4.0, %v759_v52  ;;  %v769_v47 = vmul.f32 4.0, %v760_v46  ;;  %v762_v62 = vfloor.f32 %v753_v50  ;;  %vm817_vm3 = vcmp.ge.f32.partialorder %v2282_v0, 0.5  ;;  %vm2341_vm10 = vmand %vm816_vm1, %vm825_vm2 }
 0x116   : > { %v770_v63 = vmul.f32 4.0, %v761_v60  ;;  %v763_v1 = vfloor.f32 %v754_v61  ;;  %vm826_vm4 = vcmp.lt.f32.partialorder %v2282_v0, 16.5  ;;  %v755_v54 = vmul.f32 0.25, %v2286_v49 }
 0x117   : > { %v777_v2 = vsub.f32 %v741_v39, %v768_v59  ;;  %v778_v22 = vsub.f32 %v742_v40, %v769_v47  ;;  %v771_v48 = vmul.f32 4.0, %v762_v62  ;;  %vm818_vm5 = vcmp.ge.f32.partialorder %v2286_v49, 0.5  ;;  %v842_v40 = vld [vmem:[%s1769_s8 + $0x10] sm:$0xff]  ;;  %vm2356_vm11 = vmand %vm817_vm3, %vm826_vm4 }
 0x118   : > { %v779_v24 = vsub.f32 %v743_v41, %v770_v63  ;;  %v772_v25 = vmul.f32 4.0, %v763_v1  ;;  %v764_v26 = vfloor.f32 %v755_v54  ;;  %vm827_vm6 = vcmp.lt.f32.partialorder %v2286_v49, 16.5  ;;  %v843_v41 = vld [vmem:[%s1769_s8 + $0x18] sm:$0xff] }
 0x119   : > { %v786_v27 = vsel %vm1729_vm0, %v759_v52, %v777_v2  ;;  %v787_v23 = vsel %vm1729_vm0, %v760_v46, %v778_v22  ;;  %v780_v55 = vsub.f32 %v744_v42, %v771_v48  ;;  %v756_v28 = vmul.f32 0.25, %v2290_v57  ;;  %vm836_vm14 = vmand %vm818_vm5, %vm827_vm6 }
 0x11a   : > { %v795_v29 = vadd.f32 %v786_v27, %v1751_v13  ;;  %v796_v30 = vadd.f32 %v787_v23, %v1753_v14  ;;  %v788_v56 = vsel %vm1729_vm0, %v761_v60, %v779_v24  ;;  %v781_v32 = vsub.f32 %v2282_v0, %v772_v25 }
 0x11b   : > { %v797_v35 = vadd.f32 %v788_v56, %v1755_v15  ;;  %v789_v58 = vsel %vm1729_vm0, %v762_v62, %v780_v55  ;;  %v773_v37 = vmul.f32 4.0, %v764_v26  ;;  %v765_v38 = vfloor.f32 %v756_v28 }
 0x11c   : > { %v804_v39 = vmul.f32 32.0, %v795_v29  ;;  %v805_v44 = vmul.f32 32.0, %v796_v30  ;;  %v798_v51 = vadd.f32 %v789_v58, %v1757_v16  ;;  %v790_v52 = vsel %vm1729_vm0, %v763_v1, %v781_v32  ;;  %v844_v1 = vld [vmem:[%s1769_s8 + $0x20] sm:$0xff]  ;;  %v846_v30 = vld [vmem:[%s1769_s8 + $0x30] sm:$0xff] }
 0x11d   : > { %v806_v46 = vmul.f32 32.0, %v797_v35  ;;  %v799_v60 = vadd.f32 %v790_v52, %v1759_v17  ;;  %v782_v61 = vsub.f32 %v2286_v49, %v773_v37  ;;  %v774_v59 = vmul.f32 4.0, %v765_v38  ;;  %v847_v37 = vld [vmem:[%s1769_s8 + $0x38] sm:$0xff] }
 0x11e   : > { %v849_v47 = vsel %vm2310_vm7, %v804_v39, %v840_v33  ;;  %v850_v62 = vsel %vm2321_vm8, %v805_v44, %v841_v36  ;;  %v807_v63 = vmul.f32 32.0, %v798_v51  ;;  %vm819_vm12 = vcmp.ge.f32.partialorder %v2290_v57, 0.5 }
 0x11f   : > { %858 = vst [vmem:[%s1769_s8] sm:$0xff] %v849_v47  ;;  %859 = vst [vmem:[%s1769_s8 + $0x8] sm:$0xff] %v850_v62  ;;  %v851_v54 = vsel %vm2331_vm9, %v806_v46, %v842_v40  ;;  %v808_v2 = vmul.f32 32.0, %v799_v60  ;;  %v791_v22 = vsel %vm1729_vm0, %v764_v26, %v782_v61  ;;  %v783_v0 = vsub.f32 %v2290_v57, %v774_v59  ;;  %v845_v26 = vld [vmem:[%s1769_s8 + $0x28] sm:$0xff] }
 0x120   : > { %860 = vst [vmem:[%s1769_s8 + $0x10] sm:$0xff] %v851_v54  ;;  %v852_v48 = vsel %vm2341_vm10, %v807_v63, %v843_v41  ;;  %v800_v24 = vadd.f32 %v791_v22, %v1761_v18  ;;  %vm828_vm13 = vcmp.lt.f32.partialorder %v2290_v57, 16.5  ;;  %v757_v25 = vmul.f32 0.25, %v2294_v43 }
 0x121   : > { %861 = vst [vmem:[%s1769_s8 + $0x18] sm:$0xff] %v852_v48  ;;  %v853_v27 = vsel %vm2356_vm11, %v808_v2, %v844_v1  ;;  %v792_v23 = vsel %vm1729_vm0, %v765_v38, %v783_v0  ;;  %v749_v31 = vadd.f32 %v2270_v53, %v1749_v12  ;;  %vm837_vm15 = vmand %vm819_vm12, %vm828_vm13  ;;  %vm820_vm1 = vcmp.ge.f32.partialorder %v2294_v43, 0.5 }
 0x122   : > { %862 = vst [vmem:[%s1769_s8 + $0x20] sm:$0xff] %v853_v27  ;;  %v809_v55 = vmul.f32 32.0, %v800_v24  ;;  %v801_v28 = vadd.f32 %v792_v23, %v1763_v19  ;;  %v766_v29 = vfloor.f32 %v757_v25  ;;  %vm829_vm2 = vcmp.lt.f32.partialorder %v2294_v43, 16.5 }
 0x123   : > { %v758_v33 = vmul.f32 0.25, %v749_v31  ;;  %vm838_vm3 = vmand %vm820_vm1, %vm829_vm2  ;;  %vm821_vm4 = vcmp.ge.f32.partialorder %v749_v31, 0.5  ;;  %vm830_vm5 = vcmp.lt.f32.partialorder %v749_v31, 16.5 }
 0x124   : > { %v854_v49 = vsel %vm836_vm14, %v809_v55, %v845_v26  ;;  %v810_v56 = vmul.f32 32.0, %v801_v28  ;;  %v775_v32 = vmul.f32 4.0, %v766_v29  ;;  %vm839_vm6 = vmand %vm821_vm4, %vm830_vm5 }
 0x125   : > { %863 = vst [vmem:[%s1769_s8 + $0x28] sm:$0xff] %v854_v49  ;;  %v767_v35 = vfloor.f32 %v758_v33 }
 0x126   : > { %v855_v34 = vsel %vm837_vm15, %v810_v56, %v846_v30  ;;  %v784_v36 = vsub.f32 %v2294_v43, %v775_v32  ;;  %v848_v43 = vld [vmem:[%s1769_s8 + $0x40] sm:$0xff] }
 0x127   : > { %864 = vst [vmem:[%s1769_s8 + $0x30] sm:$0xff] %v855_v34  ;;  %v776_v57 = vmul.f32 4.0, %v767_v35 }
 0x128   : > { %v793_v53 = vsel %vm1729_vm0, %v766_v29, %v784_v36 }
 0x129   : > { %v802_v58 = vadd.f32 %v793_v53, %v1765_v20  ;;  %v785_v38 = vsub.f32 %v749_v31, %v776_v57 }
 0x12b   : > { %v811_v39 = vmul.f32 32.0, %v802_v58  ;;  %v794_v44 = vsel %vm1729_vm0, %v767_v35, %v785_v38 }
 0x12c   : > { %v803_v40 = vadd.f32 %v794_v44, %v1767_v21 }
 0x12d   : > { %v856_v45 = vsel %vm838_vm3, %v811_v39, %v847_v37 }
 0x12e   : > { %865 = vst [vmem:[%s1769_s8 + $0x38] sm:$0xff] %v856_v45  ;;  %v812_v51 = vmul.f32 32.0, %v803_v40 }
 0x130   : > { %v857_v52 = vsel %vm839_vm6, %v812_v51, %v848_v43 }
 0x131   : > { %866 = vst [vmem:[%s1769_s8 + $0x40] sm:$0xff] %v857_v52 }
 0x132 PF: > { %p867_p6 = scmp.ge.s32.totalorder %s1719_s26, 12096  ;;  %p868_p9 = scmp.le.s32.totalorder %s1727_s7, 12240 }
 0x133   : > { %p871_p10 = scmp.lt.s32.totalorder %s1719_s26, 12240  ;;  %p872_p1 = scmp.gt.s32.totalorder %s1727_s7, 12096 }
 0x134   : > { %s878_s28 = sadd.f32 -335.5, %s1724_s6  ;;  %p869_p2 = pnand %p868_p9, %p867_p6 }
 0x135   : > { %p873_p3 = pnand %p872_p1, %p871_p10 }
 0x136   : > { %880 = sbr.rel (%p869_p2) target bundleno = 342 (0x156), region = 68  ;;  %v2418_v46 = vstv (!%p869_p2), %s878_s28 }
 0x137   : > { %p874_p4 = pneg %p873_p3  ;;  %v882_v50 = vadd.f32 (!%p869_p2), %v2418_v46, %v1733_v4  ;;  %v883_v41 = vadd.f32 (!%p869_p2), %v2418_v46, %v1735_v5  ;;  %v884_v60 = vadd.f32 (!%p869_p2), %v2418_v46, %v1737_v6  ;;  %v885_v61 = vadd.f32 (!%p869_p2), %v2418_v46, %v1739_v7 }
 0x138   : > { %v886_v59 = vadd.f32 (!%p869_p2), %v2418_v46, %v1741_v8  ;;  %v887_v47 = vadd.f32 (!%p869_p2), %v2418_v46, %v1743_v9  ;;  %v888_v62 = vadd.f32 (!%p869_p2), %v2418_v46, %v1745_v10  ;;  %v889_v63 = vadd.f32 (!%p869_p2), %v2418_v46, %v1747_v11 }
 0x139   : > { %p2412_p7 = pnand %p874_p4, %p869_p2  ;;  %v891_v42 = vmul.f32 (!%p869_p2), 0.5, %v882_v50  ;;  %v892_v1 = vmul.f32 (!%p869_p2), 0.5, %v883_v41  ;;  %v893_v54 = vmul.f32 (!%p869_p2), 0.5, %v884_v60  ;;  %v894_v2 = vmul.f32 (!%p869_p2), 0.5, %v885_v61 }
 0x13a   : > { %v895_v22 = vmul.f32 (!%p869_p2), 0.5, %v886_v59  ;;  %v896_v0 = vmul.f32 (!%p869_p2), 0.5, %v887_v47  ;;  %v897_v48 = vmul.f32 (!%p869_p2), 0.5, %v888_v62  ;;  %v898_v24 = vmul.f32 (!%p869_p2), 0.5, %v889_v63 }
 0x13b   : > { %v900_v25 = vfloor.f32 (!%p869_p2), %v891_v42  ;;  %v901_v27 = vfloor.f32 (!%p869_p2), %v892_v1  ;;  %v902_v26 = vfloor.f32 (!%p869_p2), %v893_v54  ;;  %v903_v23 = vfloor.f32 (!%p869_p2), %v894_v2 }
 0x13c   : > { %v904_v55 = vfloor.f32 (!%p869_p2), %v895_v22  ;;  %v905_v28 = vfloor.f32 (!%p869_p2), %v896_v0  ;;  %v906_v29 = vfloor.f32 (!%p869_p2), %v897_v48  ;;  %v907_v31 = vfloor.f32 (!%p869_p2), %v898_v24 }
 0x13d   : > { %v909_v30 = vmul.f32 2.0, %v900_v25  ;;  %v910_v49 = vmul.f32 2.0, %v901_v27  ;;  %v911_v56 = vmul.f32 2.0, %v902_v26  ;;  %v912_v32 = vmul.f32 2.0, %v903_v23 }
 0x13e   : > { %v913_v33 = vmul.f32 2.0, %v904_v55  ;;  %v914_v34 = vmul.f32 2.0, %v905_v28  ;;  %v915_v36 = vmul.f32 2.0, %v906_v29  ;;  %v916_v35 = vmul.f32 2.0, %v907_v31 }
 0x13f   : > { %v918_v53 = vsub.f32 %v882_v50, %v909_v30  ;;  %v919_v57 = vsub.f32 %v883_v41, %v910_v49  ;;  %v920_v58 = vsub.f32 %v884_v60, %v911_v56  ;;  %v921_v37 = vsub.f32 %v885_v61, %v912_v32 }
 0x140   : > { %v922_v38 = vsub.f32 %v886_v59, %v913_v33  ;;  %v923_v39 = vsub.f32 %v887_v47, %v914_v34  ;;  %v924_v44 = vsub.f32 %v888_v62, %v915_v36  ;;  %v925_v45 = vsub.f32 %v889_v63, %v916_v35 }
 0x141   : > { %v927_v40 = vsel %vm1729_vm0, %v900_v25, %v918_v53  ;;  %v928_v43 = vsel %vm1729_vm0, %v901_v27, %v919_v57  ;;  %v929_v51 = vsel %vm1729_vm0, %v902_v26, %v920_v58  ;;  %v930_v52 = vsel %vm1729_vm0, %v903_v23, %v921_v37 }
 0x142   : > { %v936_v50 = vadd.f32 %v927_v40, %v1751_v13  ;;  %v937_v41 = vadd.f32 %v928_v43, %v1753_v14  ;;  %v938_v60 = vadd.f32 %v929_v51, %v1755_v15  ;;  %v939_v61 = vadd.f32 %v930_v52, %v1757_v16 }
 0x143   : > { %v931_v59 = vsel %vm1729_vm0, %v904_v55, %v922_v38  ;;  %v932_v47 = vsel %vm1729_vm0, %v905_v28, %v923_v39  ;;  %v933_v62 = vsel %vm1729_vm0, %v906_v29, %v924_v44  ;;  %v934_v63 = vsel %vm1729_vm0, %v907_v31, %v925_v45 }
 0x144   : > { %v945_v42 = vmul.f32 64.0, %v936_v50  ;;  %v946_v1 = vmul.f32 64.0, %v937_v41  ;;  %v947_v54 = vmul.f32 64.0, %v938_v60  ;;  %v948_v2 = vmul.f32 64.0, %v939_v61 }
 0x145   : > { %v940_v22 = vadd.f32 %v931_v59, %v1759_v17  ;;  %v941_v0 = vadd.f32 %v932_v47, %v1761_v18  ;;  %v942_v48 = vadd.f32 %v933_v62, %v1763_v19  ;;  %v943_v24 = vadd.f32 %v934_v63, %v1765_v20 }
 0x146   : > { %954 = vst [vmem:[%s1769_s8] sm:$0xff] %v945_v42  ;;  %955 = vst [vmem:[%s1769_s8 + $0x8] sm:$0xff] %v946_v1  ;;  %v890_v25 = vadd.f32 %v2418_v46, %v1749_v12 }
 0x147   : > { %956 = vst [vmem:[%s1769_s8 + $0x10] sm:$0xff] %v947_v54  ;;  %957 = vst [vmem:[%s1769_s8 + $0x18] sm:$0xff] %v948_v2  ;;  %v949_v27 = vmul.f32 64.0, %v940_v22  ;;  %v950_v26 = vmul.f32 64.0, %v941_v0  ;;  %v951_v23 = vmul.f32 64.0, %v942_v48  ;;  %v952_v55 = vmul.f32 64.0, %v943_v24 }
 0x148   : > { %v899_v28 = vmul.f32 0.5, %v890_v25 }
 0x149   : > { %958 = vst [vmem:[%s1769_s8 + $0x20] sm:$0xff] %v949_v27  ;;  %959 = vst [vmem:[%s1769_s8 + $0x28] sm:$0xff] %v950_v26 }
 0x14a   : > { %960 = vst [vmem:[%s1769_s8 + $0x30] sm:$0xff] %v951_v23  ;;  %961 = vst [vmem:[%s1769_s8 + $0x38] sm:$0xff] %v952_v55  ;;  %v908_v29 = vfloor.f32 %v899_v28 }
 0x14c   : > { %v917_v31 = vmul.f32 2.0, %v908_v29 }
 0x14e   : > { %v926_v30 = vsub.f32 %v890_v25, %v917_v31 }
 0x150   : > { %v935_v49 = vsel %vm1729_vm0, %v908_v29, %v926_v30 }
 0x151   : > { %v944_v56 = vadd.f32 %v935_v49, %v1767_v21 }
 0x153   : > { %v953_v32 = vmul.f32 64.0, %v944_v56 }
 0x155   : > { %962 = vst [vmem:[%s1769_s8 + $0x40] sm:$0xff] %v953_v32 }
 0x156 PF: > { %964 = sbr.rel (%p2412_p7) target bundleno = 378 (0x17a), region = 72  ;;  %v2478_v46 = vstv (!%p2412_p7), %s878_s28  ;;  %v1065_v28 = vld [vmem:[%s1769_s8] sm:$0xff] (!%p2412_p7)  ;;  %v1066_v31 = vld [vmem:[%s1769_s8 + $0x8] sm:$0xff] (!%p2412_p7) }
 0x157   : > { %v966_v33 = vadd.f32 (!%p2412_p7), %v2478_v46, %v1733_v4  ;;  %v967_v34 = vadd.f32 (!%p2412_p7), %v2478_v46, %v1735_v5  ;;  %v968_v36 = vadd.f32 (!%p2412_p7), %v2478_v46, %v1737_v6  ;;  %v969_v35 = vadd.f32 (!%p2412_p7), %v2478_v46, %v1739_v7 }
 0x158   : > { %v2490_v53 = vadd.f32 (!%p2412_p7), %v2478_v46, %v1741_v8  ;;  %v2494_v57 = vadd.f32 (!%p2412_p7), %v2478_v46, %v1743_v9  ;;  %v2498_v58 = vadd.f32 (!%p2412_p7), %v2478_v46, %v1745_v10  ;;  %v2502_v37 = vadd.f32 (!%p2412_p7), %v2478_v46, %v1747_v11 }
 0x159   : > { %v975_v38 = vmul.f32 (!%p2412_p7), 0.5, %v966_v33  ;;  %vm1038_vm7 = vcmp.ge.f32.partialorder (!%p2412_p7), %v966_v33, 0.5  ;;  %vm1047_vm8 = vcmp.lt.f32.partialorder (!%p2412_p7), %v966_v33, 4.5  ;;  %v976_v39 = vmul.f32 (!%p2412_p7), 0.5, %v967_v34 }
 0x15a   : > { %vm1039_vm9 = vcmp.ge.f32.partialorder (!%p2412_p7), %v967_v34, 0.5  ;;  %vm1048_vm10 = vcmp.lt.f32.partialorder (!%p2412_p7), %v967_v34, 4.5  ;;  %v977_v44 = vmul.f32 (!%p2412_p7), 0.5, %v968_v36  ;;  %vm1040_vm11 = vcmp.ge.f32.partialorder (!%p2412_p7), %v968_v36, 0.5  ;;  %vm2518_vm4 = vmand (!%p2412_p7), %vm1038_vm7, %vm1047_vm8 }
 0x15b   : > { %v984_v45 = vfloor.f32 (!%p2412_p7), %v975_v38  ;;  %v985_v40 = vfloor.f32 (!%p2412_p7), %v976_v39  ;;  %vm1049_vm12 = vcmp.lt.f32.partialorder (!%p2412_p7), %v968_v36, 4.5  ;;  %v978_v43 = vmul.f32 (!%p2412_p7), 0.5, %v969_v35  ;;  %vm2529_vm5 = vmand (!%p2412_p7), %vm1039_vm9, %vm1048_vm10 }
 0x15c   : > { %v986_v51 = vfloor.f32 (!%p2412_p7), %v977_v44  ;;  %vm1041_vm13 = vcmp.ge.f32.partialorder (!%p2412_p7), %v969_v35, 0.5  ;;  %vm1050_vm14 = vcmp.lt.f32.partialorder (!%p2412_p7), %v969_v35, 4.5  ;;  %v979_v52 = vmul.f32 (!%p2412_p7), 0.5, %v2490_v53  ;;  %vm2539_vm6 = vmand (!%p2412_p7), %vm1040_vm11, %vm1049_vm12 }
 0x15d   : > { %v993_v50 = vmul.f32 2.0, %v984_v45  ;;  %v994_v41 = vmul.f32 2.0, %v985_v40  ;;  %v987_v60 = vfloor.f32 %v978_v43  ;;  %vm1042_vm15 = vcmp.ge.f32.partialorder %v2490_v53, 0.5  ;;  %vm2549_vm7 = vmand %vm1041_vm13, %vm1050_vm14 }
 0x15e   : > { %v995_v61 = vmul.f32 2.0, %v986_v51  ;;  %v988_v59 = vfloor.f32 %v979_v52  ;;  %vm1051_vm1 = vcmp.lt.f32.partialorder %v2490_v53, 4.5  ;;  %v980_v47 = vmul.f32 0.5, %v2494_v57 }
 0x15f   : > { %v1002_v62 = vsub.f32 %v966_v33, %v993_v50  ;;  %v1003_v63 = vsub.f32 %v967_v34, %v994_v41  ;;  %v996_v42 = vmul.f32 2.0, %v987_v60  ;;  %vm1043_vm2 = vcmp.ge.f32.partialorder %v2494_v57, 0.5  ;;  %v1067_v34 = vld [vmem:[%s1769_s8 + $0x10] sm:$0xff]  ;;  %vm2564_vm8 = vmand %vm1042_vm15, %vm1051_vm1 }
 0x160   : > { %v1004_v1 = vsub.f32 %v968_v36, %v995_v61  ;;  %v997_v54 = vmul.f32 2.0, %v988_v59  ;;  %v989_v2 = vfloor.f32 %v980_v47  ;;  %vm1052_vm3 = vcmp.lt.f32.partialorder %v2494_v57, 4.5  ;;  %v1068_v36 = vld [vmem:[%s1769_s8 + $0x18] sm:$0xff] }
 0x161   : > { %v1011_v22 = vsel %vm1729_vm0, %v984_v45, %v1002_v62  ;;  %v1012_v0 = vsel %vm1729_vm0, %v985_v40, %v1003_v63  ;;  %v1005_v48 = vsub.f32 %v969_v35, %v996_v42  ;;  %v981_v24 = vmul.f32 0.5, %v2498_v58  ;;  %vm1061_vm11 = vmand %vm1043_vm2, %vm1052_vm3 }
 0x162   : > { %v1020_v25 = vadd.f32 %v1011_v22, %v1751_v13  ;;  %v1021_v26 = vadd.f32 %v1012_v0, %v1753_v14  ;;  %v1013_v23 = vsel %vm1729_vm0, %v986_v51, %v1004_v1  ;;  %v1006_v55 = vsub.f32 %v2490_v53, %v997_v54 }
 0x163   : > { %v1022_v30 = vadd.f32 %v1013_v23, %v1755_v15  ;;  %v1014_v49 = vsel %vm1729_vm0, %v987_v60, %v1005_v48  ;;  %v998_v56 = vmul.f32 2.0, %v989_v2  ;;  %v990_v32 = vfloor.f32 %v981_v24 }
 0x164   : > { %v1029_v33 = vmul.f32 64.0, %v1020_v25  ;;  %v1030_v38 = vmul.f32 64.0, %v1021_v26  ;;  %v1023_v44 = vadd.f32 %v1014_v49, %v1757_v16  ;;  %v1015_v45 = vsel %vm1729_vm0, %v988_v59, %v1006_v55  ;;  %v1069_v59 = vld [vmem:[%s1769_s8 + $0x20] sm:$0xff]  ;;  %v1071_v26 = vld [vmem:[%s1769_s8 + $0x30] sm:$0xff] }
 0x165   : > { %v1031_v40 = vmul.f32 64.0, %v1022_v30  ;;  %v1024_v51 = vadd.f32 %v1015_v45, %v1759_v17  ;;  %v1007_v52 = vsub.f32 %v2494_v57, %v998_v56  ;;  %v999_v50 = vmul.f32 2.0, %v990_v32  ;;  %v1072_v56 = vld [vmem:[%s1769_s8 + $0x38] sm:$0xff] }
 0x166   : > { %v1074_v41 = vsel %vm2518_vm4, %v1029_v33, %v1065_v28  ;;  %v1075_v60 = vsel %vm2529_vm5, %v1030_v38, %v1066_v31  ;;  %v1032_v61 = vmul.f32 64.0, %v1023_v44  ;;  %vm1044_vm9 = vcmp.ge.f32.partialorder %v2498_v58, 0.5 }
 0x167   : > { %1083 = vst [vmem:[%s1769_s8] sm:$0xff] %v1074_v41  ;;  %1084 = vst [vmem:[%s1769_s8 + $0x8] sm:$0xff] %v1075_v60  ;;  %v1076_v47 = vsel %vm2539_vm6, %v1031_v40, %v1067_v34  ;;  %v1033_v62 = vmul.f32 64.0, %v1024_v51  ;;  %v1016_v63 = vsel %vm1729_vm0, %v989_v2, %v1007_v52  ;;  %v1008_v53 = vsub.f32 %v2498_v58, %v999_v50  ;;  %v1070_v2 = vld [vmem:[%s1769_s8 + $0x28] sm:$0xff] }
 0x168   : > { %1085 = vst [vmem:[%s1769_s8 + $0x10] sm:$0xff] %v1076_v47  ;;  %v1077_v42 = vsel %vm2549_vm7, %v1032_v61, %v1068_v36  ;;  %v1025_v1 = vadd.f32 %v1016_v63, %v1761_v18  ;;  %vm1053_vm10 = vcmp.lt.f32.partialorder %v2498_v58, 4.5  ;;  %v982_v54 = vmul.f32 0.5, %v2502_v37 }
 0x169   : > { %1086 = vst [vmem:[%s1769_s8 + $0x18] sm:$0xff] %v1077_v42  ;;  %v1078_v22 = vsel %vm2564_vm8, %v1033_v62, %v1069_v59  ;;  %v1017_v0 = vsel %vm1729_vm0, %v990_v32, %v1008_v53  ;;  %v974_v27 = vadd.f32 %v2478_v46, %v1749_v12  ;;  %vm1062_vm12 = vmand %vm1044_vm9, %vm1053_vm10  ;;  %vm1045_vm13 = vcmp.ge.f32.partialorder %v2502_v37, 0.5 }
 0x16a   : > { %1087 = vst [vmem:[%s1769_s8 + $0x20] sm:$0xff] %v1078_v22  ;;  %v1034_v48 = vmul.f32 64.0, %v1025_v1  ;;  %v1026_v24 = vadd.f32 %v1017_v0, %v1763_v19  ;;  %v991_v25 = vfloor.f32 %v982_v54  ;;  %vm1054_vm14 = vcmp.lt.f32.partialorder %v2502_v37, 4.5 }
 0x16b   : > { %v983_v28 = vmul.f32 0.5, %v974_v27  ;;  %vm1063_vm15 = vmand %vm1045_vm13, %vm1054_vm14  ;;  %vm1046_vm1 = vcmp.ge.f32.partialorder %v974_v27, 0.5  ;;  %vm1055_vm2 = vcmp.lt.f32.partialorder %v974_v27, 4.5 }
 0x16c   : > { %v1079_v57 = vsel %vm1061_vm11, %v1034_v48, %v1070_v2  ;;  %v1035_v23 = vmul.f32 64.0, %v1026_v24  ;;  %v1000_v55 = vmul.f32 2.0, %v991_v25  ;;  %vm1064_vm3 = vmand %vm1046_vm1, %vm1055_vm2 }
 0x16d   : > { %1088 = vst [vmem:[%s1769_s8 + $0x28] sm:$0xff] %v1079_v57  ;;  %v992_v30 = vfloor.f32 %v983_v28 }
 0x16e   : > { %v1080_v29 = vsel %vm1062_vm12, %v1035_v23, %v1071_v26  ;;  %v1009_v31 = vsub.f32 %v2502_v37, %v1000_v55  ;;  %v1073_v37 = vld [vmem:[%s1769_s8 + $0x40] sm:$0xff] }
 0x16f   : > { %1089 = vst [vmem:[%s1769_s8 + $0x30] sm:$0xff] %v1080_v29  ;;  %v1001_v58 = vmul.f32 2.0, %v992_v30 }
 0x170   : > { %v1018_v46 = vsel %vm1729_vm0, %v991_v25, %v1009_v31 }
 0x171   : > { %v1027_v49 = vadd.f32 %v1018_v46, %v1765_v20  ;;  %v1010_v32 = vsub.f32 %v974_v27, %v1001_v58 }
 0x173   : > { %v1036_v33 = vmul.f32 64.0, %v1027_v49  ;;  %v1019_v38 = vsel %vm1729_vm0, %v992_v30, %v1010_v32 }
 0x174   : > { %v1028_v34 = vadd.f32 %v1019_v38, %v1767_v21 }
 0x175   : > { %v1081_v39 = vsel %vm1063_vm15, %v1036_v33, %v1072_v56 }
 0x176   : > { %1090 = vst [vmem:[%s1769_s8 + $0x38] sm:$0xff] %v1081_v39  ;;  %v1037_v44 = vmul.f32 64.0, %v1028_v34 }
 0x178   : > { %v1082_v45 = vsel %vm1064_vm3, %v1037_v44, %v1073_v37 }
 0x179   : > { %1091 = vst [vmem:[%s1769_s8 + $0x40] sm:$0xff] %v1082_v45 }
 0x17a PF: > { %p1092_p8 = scmp.ge.s32.totalorder %s1719_s26, 12240  ;;  %p1096_p11 = scmp.lt.s32.totalorder %s1719_s26, 12276 }
 0x17b   : > { %p1097_p13 = scmp.gt.s32.totalorder %s1727_s7, 12240  ;;  %s1103_s30 = sadd.f32 -339.5, %s1724_s6 }
 0x17c   : > { %p1094_p5 = pnand %p1375_p12, %p1092_p8 }
 0x17d   : > { %p1098_p0 = pnand %p1097_p13, %p1096_p11  ;;  %v1106_v40 = vstv (!%p1094_p5), %s1103_s30 }
 0x17e   : > { %1105 = sbr.rel (%p1094_p5) target bundleno = 405 (0x195), region = 76  ;;  %v1107_v43 = vadd.f32 (!%p1094_p5), %v1106_v40, %v1733_v4  ;;  %v1108_v36 = vadd.f32 (!%p1094_p5), %v1106_v40, %v1735_v5  ;;  %v1109_v51 = vadd.f32 (!%p1094_p5), %v1106_v40, %v1737_v6  ;;  %v1110_v52 = vadd.f32 (!%p1094_p5), %v1106_v40, %v1739_v7 }
 0x17f   : > { %p1099_p6 = pneg %p1098_p0  ;;  %v1111_v50 = vadd.f32 (!%p1094_p5), %v1106_v40, %v1741_v8  ;;  %v1112_v41 = vadd.f32 (!%p1094_p5), %v1106_v40, %v1743_v9  ;;  %v1113_v60 = vadd.f32 (!%p1094_p5), %v1106_v40, %v1745_v10  ;;  %v1114_v61 = vadd.f32 (!%p1094_p5), %v1106_v40, %v1747_v11 }
 0x180   : > { %v1116_v35 = vfloor.f32 (!%p1094_p5), %v1107_v43  ;;  %v1117_v59 = vfloor.f32 (!%p1094_p5), %v1108_v36  ;;  %v1118_v47 = vfloor.f32 (!%p1094_p5), %v1109_v51  ;;  %v1119_v62 = vfloor.f32 (!%p1094_p5), %v1110_v52 }
 0x181   : > { %p2621_p9 = pnand %p1099_p6, %p1094_p5  ;;  %v1120_v63 = vfloor.f32 (!%p1094_p5), %v1111_v50  ;;  %v1121_v53 = vfloor.f32 (!%p1094_p5), %v1112_v41  ;;  %v1122_v42 = vfloor.f32 (!%p1094_p5), %v1113_v60  ;;  %v1123_v1 = vfloor.f32 (!%p1094_p5), %v1114_v61 }
 0x182   : > { %v1125_v54 = vsub.f32 (!%p1094_p5), %v1107_v43, %v1116_v35  ;;  %v1126_v22 = vsub.f32 (!%p1094_p5), %v1108_v36, %v1117_v59  ;;  %v1127_v2 = vsub.f32 (!%p1094_p5), %v1109_v51, %v1118_v47  ;;  %v1128_v0 = vsub.f32 (!%p1094_p5), %v1110_v52, %v1119_v62 }
 0x183   : > { %v1129_v48 = vsub.f32 (!%p1094_p5), %v1111_v50, %v1120_v63  ;;  %v1130_v24 = vsub.f32 (!%p1094_p5), %v1112_v41, %v1121_v53  ;;  %v1131_v25 = vsub.f32 (!%p1094_p5), %v1113_v60, %v1122_v42  ;;  %v1132_v27 = vsub.f32 (!%p1094_p5), %v1114_v61, %v1123_v1 }
 0x184   : > { %v1134_v26 = vsel (!%p1094_p5), %vm1729_vm0, %v1116_v35, %v1125_v54  ;;  %v1135_v57 = vsel (!%p1094_p5), %vm1729_vm0, %v1117_v59, %v1126_v22  ;;  %v1136_v23 = vsel (!%p1094_p5), %vm1729_vm0, %v1118_v47, %v1127_v2  ;;  %v1137_v55 = vsel (!%p1094_p5), %vm1729_vm0, %v1119_v62, %v1128_v0 }
 0x185   : > { %v1143_v28 = vadd.f32 %v1134_v26, %v1751_v13  ;;  %v1144_v29 = vadd.f32 %v1135_v57, %v1753_v14  ;;  %v1145_v31 = vadd.f32 %v1136_v23, %v1755_v15  ;;  %v1146_v30 = vadd.f32 %v1137_v55, %v1757_v16 }
 0x186   : > { %v1138_v46 = vsel %vm1729_vm0, %v1120_v63, %v1129_v48  ;;  %v1139_v58 = vsel %vm1729_vm0, %v1121_v53, %v1130_v24  ;;  %v1140_v49 = vsel %vm1729_vm0, %v1122_v42, %v1131_v25  ;;  %v1141_v56 = vsel %vm1729_vm0, %v1123_v1, %v1132_v27 }
 0x187   : > { %v1152_v32 = vmul.f32 128.0, %v1143_v28  ;;  %v1153_v33 = vmul.f32 128.0, %v1144_v29  ;;  %v1154_v38 = vmul.f32 128.0, %v1145_v31  ;;  %v1155_v39 = vmul.f32 128.0, %v1146_v30 }
 0x188   : > { %v1147_v34 = vadd.f32 %v1138_v46, %v1759_v17  ;;  %v1148_v37 = vadd.f32 %v1139_v58, %v1761_v18  ;;  %v1149_v44 = vadd.f32 %v1140_v49, %v1763_v19  ;;  %v1150_v45 = vadd.f32 %v1141_v56, %v1765_v20 }
 0x189   : > { %1161 = vst [vmem:[%s1769_s8] sm:$0xff] %v1152_v32  ;;  %1162 = vst [vmem:[%s1769_s8 + $0x8] sm:$0xff] %v1153_v33  ;;  %v1115_v43 = vadd.f32 %v1106_v40, %v1749_v12 }
 0x18a   : > { %1163 = vst [vmem:[%s1769_s8 + $0x10] sm:$0xff] %v1154_v38  ;;  %1164 = vst [vmem:[%s1769_s8 + $0x18] sm:$0xff] %v1155_v39  ;;  %v1156_v36 = vmul.f32 128.0, %v1147_v34  ;;  %v1157_v51 = vmul.f32 128.0, %v1148_v37  ;;  %v1158_v52 = vmul.f32 128.0, %v1149_v44  ;;  %v1159_v50 = vmul.f32 128.0, %v1150_v45 }
 0x18b   : > { %v1124_v41 = vfloor.f32 %v1115_v43 }
 0x18c   : > { %1165 = vst [vmem:[%s1769_s8 + $0x20] sm:$0xff] %v1156_v36  ;;  %1166 = vst [vmem:[%s1769_s8 + $0x28] sm:$0xff] %v1157_v51 }
 0x18d   : > { %1167 = vst [vmem:[%s1769_s8 + $0x30] sm:$0xff] %v1158_v52  ;;  %1168 = vst [vmem:[%s1769_s8 + $0x38] sm:$0xff] %v1159_v50  ;;  %v1133_v60 = vsub.f32 %v1115_v43, %v1124_v41 }
 0x18f   : > { %v1142_v61 = vsel %vm1729_vm0, %v1124_v41, %v1133_v60 }
 0x190   : > { %v1151_v35 = vadd.f32 %v1142_v61, %v1767_v21 }
 0x192   : > { %v1160_v59 = vmul.f32 128.0, %v1151_v35 }
 0x194   : > { %1169 = vst [vmem:[%s1769_s8 + $0x40] sm:$0xff] %v1160_v59 }
 0x195 PF: > { %1171 = sbr.rel (%p2621_p9) target bundleno = 433 (0x1b1), region = 80  ;;  %v2676_v40 = vstv (!%p2621_p9), %s1103_s30  ;;  %v1254_v23 = vld [vmem:[%s1769_s8] sm:$0xff] (!%p2621_p9)  ;;  %v1256_v58 = vld [vmem:[%s1769_s8 + $0x10] sm:$0xff] (!%p2621_p9)  ;;  %v1257_v33 = vld [vmem:[%s1769_s8 + $0x18] sm:$0xff] (!%p2621_p9) }
 0x196   : > { %v1173_v47 = vadd.f32 (!%p2621_p9), %v2676_v40, %v1733_v4  ;;  %v1174_v62 = vadd.f32 (!%p2621_p9), %v2676_v40, %v1735_v5  ;;  %v1175_v63 = vadd.f32 (!%p2621_p9), %v2676_v40, %v1737_v6  ;;  %v1176_v53 = vadd.f32 (!%p2621_p9), %v2676_v40, %v1739_v7  ;;  %v1259_v61 = vld [vmem:[%s1769_s8 + $0x28] sm:$0xff] (!%p2621_p9) }
 0x197   : > { %v1177_v42 = vadd.f32 (!%p2621_p9), %v2676_v40, %v1741_v8  ;;  %v2690_v1 = vadd.f32 (!%p2621_p9), %v2676_v40, %v1743_v9  ;;  %v2694_v54 = vadd.f32 (!%p2621_p9), %v2676_v40, %v1745_v10  ;;  %v2698_v4 = vadd.f32 (!%p2621_p9), %v2676_v40, %v1747_v11 }
 0x198   : > { %v1182_v5 = vfloor.f32 (!%p2621_p9), %v1173_v47  ;;  %vm1227_vm4 = vcmp.ge.f32.partialorder (!%p2621_p9), %v1173_v47, 0.5  ;;  %vm1236_vm5 = vcmp.lt.f32.partialorder (!%p2621_p9), %v1173_v47, 1.5  ;;  %v1183_v6 = vfloor.f32 (!%p2621_p9), %v1174_v62 }
 0x199   : > { %vm1228_vm6 = vcmp.ge.f32.partialorder (!%p2621_p9), %v1174_v62, 0.5  ;;  %vm1237_vm7 = vcmp.lt.f32.partialorder (!%p2621_p9), %v1174_v62, 1.5  ;;  %v1184_v7 = vfloor.f32 (!%p2621_p9), %v1175_v63  ;;  %vm1229_vm8 = vcmp.ge.f32.partialorder (!%p2621_p9), %v1175_v63, 0.5  ;;  %vm2707_vm13 = vmand (!%p2621_p9), %vm1227_vm4, %vm1236_vm5 }
 0x19a   : > { %v1191_v8 = vsub.f32 (!%p2621_p9), %v1173_v47, %v1182_v5  ;;  %v1192_v22 = vsub.f32 (!%p2621_p9), %v1174_v62, %v1183_v6  ;;  %vm1238_vm9 = vcmp.lt.f32.partialorder (!%p2621_p9), %v1175_v63, 1.5  ;;  %v1185_v9 = vfloor.f32 (!%p2621_p9), %v1176_v53  ;;  %vm2717_vm14 = vmand (!%p2621_p9), %vm1228_vm6, %vm1237_vm7 }
 0x19b   : > { %v1193_v10 = vsub.f32 (!%p2621_p9), %v1175_v63, %v1184_v7  ;;  %vm1230_vm10 = vcmp.ge.f32.partialorder (!%p2621_p9), %v1176_v53, 0.5  ;;  %vm1239_vm11 = vcmp.lt.f32.partialorder (!%p2621_p9), %v1176_v53, 1.5  ;;  %v1186_v2 = vfloor.f32 (!%p2621_p9), %v1177_v42  ;;  %vm2728_vm1 = vmand (!%p2621_p9), %vm1229_vm8, %vm1238_vm9 }
 0x19c   : > { %v1200_v11 = vsel %vm1729_vm0, %v1182_v5, %v1191_v8  ;;  %v1201_v0 = vsel %vm1729_vm0, %v1183_v6, %v1192_v22  ;;  %v1194_v48 = vsub.f32 %v1176_v53, %v1185_v9  ;;  %vm1231_vm12 = vcmp.ge.f32.partialorder %v1177_v42, 0.5  ;;  %vm2738_vm2 = vmand %vm1230_vm10, %vm1239_vm11 }
 0x19d   : > { %v1209_v24 = vadd.f32 %v1200_v11, %v1751_v13  ;;  %v1210_v27 = vadd.f32 %v1201_v0, %v1753_v14  ;;  %v1202_v26 = vsel %vm1729_vm0, %v1184_v7, %v1193_v10  ;;  %v1195_v57 = vsub.f32 %v1177_v42, %v1186_v2  ;;  %v1255_v13 = vld [vmem:[%s1769_s8 + $0x8] sm:$0xff]  ;;  %v1261_v7 = vld [vmem:[%s1769_s8 + $0x38] sm:$0xff]  ;;  %v1262_v10 = vld [vmem:[%s1769_s8 + $0x40] sm:$0xff] }
 0x19e   : > { %v1211_v28 = vadd.f32 %v1202_v26, %v1755_v15  ;;  %v1203_v29 = vsel %vm1729_vm0, %v1185_v9, %v1194_v48  ;;  %vm1240_vm15 = vcmp.lt.f32.partialorder %v1177_v42, 1.5  ;;  %v1187_v14 = vfloor.f32 %v2690_v1 }
 0x19f   : > { %v1218_v31 = vmul.f32 128.0, %v1209_v24  ;;  %v1219_v30 = vmul.f32 128.0, %v1210_v27  ;;  %v1212_v15 = vadd.f32 %v1203_v29, %v1757_v16  ;;  %v1204_v49 = vsel %vm1729_vm0, %v1186_v2, %v1195_v57  ;;  %vm2752_vm4 = vmand %vm1231_vm12, %vm1240_vm15 }
 0x1a0   : > { %v1220_v56 = vmul.f32 128.0, %v1211_v28  ;;  %v1213_v38 = vadd.f32 %v1204_v49, %v1759_v17  ;;  %v1196_v39 = vsub.f32 %v2690_v1, %v1187_v14  ;;  %vm1232_vm3 = vcmp.ge.f32.partialorder %v2690_v1, 0.5  ;;  %v1258_v17 = vld [vmem:[%s1769_s8 + $0x20] sm:$0xff] }
 0x1a1   : > { %v1263_v16 = vsel %vm2707_vm13, %v1218_v31, %v1254_v23  ;;  %v1264_v34 = vsel %vm2717_vm14, %v1219_v30, %v1255_v13  ;;  %v1221_v37 = vmul.f32 128.0, %v1212_v15  ;;  %vm1241_vm5 = vcmp.lt.f32.partialorder %v2690_v1, 1.5 }
 0x1a2   : > { %1272 = vst [vmem:[%s1769_s8] sm:$0xff] %v1263_v16  ;;  %1273 = vst [vmem:[%s1769_s8 + $0x8] sm:$0xff] %v1264_v34  ;;  %v1265_v45 = vsel %vm2728_vm1, %v1220_v56, %v1256_v58  ;;  %v1222_v43 = vmul.f32 128.0, %v1213_v38  ;;  %v1205_v36 = vsel %vm1729_vm0, %v1187_v14, %v1196_v39  ;;  %v1188_v51 = vfloor.f32 %v2694_v54 }
 0x1a3   : > { %1274 = vst [vmem:[%s1769_s8 + $0x10] sm:$0xff] %v1265_v45  ;;  %v1266_v52 = vsel %vm2738_vm2, %v1221_v37, %v1257_v33  ;;  %v1214_v50 = vadd.f32 %v1205_v36, %v1761_v18  ;;  %vm2774_vm6 = vmand %vm1232_vm3, %vm1241_vm5  ;;  %v1189_v59 = vfloor.f32 %v2698_v4  ;;  %vm1233_vm7 = vcmp.ge.f32.partialorder %v2694_v54, 0.5 }
 0x1a4   : > { %1275 = vst [vmem:[%s1769_s8 + $0x18] sm:$0xff] %v1266_v52  ;;  %v1267_v41 = vsel %vm2752_vm4, %v1222_v43, %v1258_v17  ;;  %v1197_v35 = vsub.f32 %v2694_v54, %v1188_v51  ;;  %vm1242_vm8 = vcmp.lt.f32.partialorder %v2694_v54, 1.5  ;;  %v1181_v18 = vadd.f32 %v2676_v40, %v1749_v12  ;;  %v1260_v12 = vld [vmem:[%s1769_s8 + $0x30] sm:$0xff] }
 0x1a5   : > { %1276 = vst [vmem:[%s1769_s8 + $0x20] sm:$0xff] %v1267_v41  ;;  %v1223_v47 = vmul.f32 128.0, %v1214_v50  ;;  %v1198_v63 = vsub.f32 %v2698_v4, %v1189_v59  ;;  %vm1234_vm9 = vcmp.ge.f32.partialorder %v2698_v4, 0.5  ;;  %vm1243_vm10 = vcmp.lt.f32.partialorder %v2698_v4, 1.5  ;;  %vm1251_vm11 = vmand %vm1233_vm7, %vm1242_vm8 }
 0x1a6   : > { %v1206_v62 = vsel %vm1729_vm0, %v1188_v51, %v1197_v35  ;;  %v1190_v1 = vfloor.f32 %v1181_v18  ;;  %vm1252_vm12 = vmand %vm1234_vm9, %vm1243_vm10  ;;  %vm1235_vm13 = vcmp.ge.f32.partialorder %v1181_v18, 0.5  ;;  %vm1244_vm14 = vcmp.lt.f32.partialorder %v1181_v18, 1.5 }
 0x1a7   : > { %v1268_v53 = vsel %vm2774_vm6, %v1223_v47, %v1259_v61  ;;  %v1215_v42 = vadd.f32 %v1206_v62, %v1763_v19  ;;  %v1207_v40 = vsel %vm1729_vm0, %v1189_v59, %v1198_v63  ;;  %vm1253_vm15 = vmand %vm1235_vm13, %vm1244_vm14 }
 0x1a8   : > { %1277 = vst [vmem:[%s1769_s8 + $0x28] sm:$0xff] %v1268_v53  ;;  %v1216_v5 = vadd.f32 %v1207_v40, %v1765_v20  ;;  %v1199_v6 = vsub.f32 %v1181_v18, %v1190_v1 }
 0x1a9   : > { %v1224_v54 = vmul.f32 128.0, %v1215_v42 }
 0x1aa   : > { %v1225_v4 = vmul.f32 128.0, %v1216_v5  ;;  %v1208_v8 = vsel %vm1729_vm0, %v1190_v1, %v1199_v6 }
 0x1ab   : > { %v1269_v19 = vsel %vm1251_vm11, %v1224_v54, %v1260_v12  ;;  %v1217_v22 = vadd.f32 %v1208_v8, %v1767_v21 }
 0x1ac   : > { %1278 = vst [vmem:[%s1769_s8 + $0x30] sm:$0xff] %v1269_v19  ;;  %v1270_v9 = vsel %vm1252_vm12, %v1225_v4, %v1261_v7 }
 0x1ad   : > { %1279 = vst [vmem:[%s1769_s8 + $0x38] sm:$0xff] %v1270_v9  ;;  %v1226_v2 = vmul.f32 128.0, %v1217_v22 }
 0x1af   : > { %v1271_v20 = vsel %vm1253_vm15, %v1226_v2, %v1262_v10 }
 0x1b0   : > { %1280 = vst [vmem:[%s1769_s8 + $0x40] sm:$0xff] %v1271_v20 }
 0x1b1 PF: > { %s1379_s3 = smul.u32 1152, %s1618_s13  ;;  %s1295_s4 = sshll.u32 %s1769_s8, 4  ;;  %s2814_s4 = int_to_ptr.vmem [resolvable:$true] %s1295_s4 }
 0x1b2   : > { %s2818_s6 = scalar_lea.sflag [#allocation4], %s149_s24  ;;  %s1502_s7 = scalar_lea.vmem %s2814_s4, 1152 }
 0x1b3   : > { %s2812_s5 = scalar_lea.hbm %s2861_s2, %s1379_s3  ;;  %p1503_p12 = scmp.ne.s32.totalorder %s2814_s4, %s1502_s7 }
 0x1b4   : > { %p2933_p10 = scmp.ne.s32.totalorder %s2865_s19, 0  ;;  %s1579_s13 = smov [#allocation7]  }
 0x1b5   : > { %s1506_s8 = sshll.u32 %s1579_s13, 4  ;;  %s1507_s8 = int_to_ptr.vmem [resolvable:$false] %s1506_s8 }
 0x1b6   : > { %p1504_p1 = pnand %p1503_p12, %p2933_p10  ;;  %s1508_s14 = scalar_lea.vmem %s1507_s8, 2304 }
 0x1b7   : > { %p1509_p3 = scmp.lt.s32.totalorder %s2814_s4, %s1507_s8  ;;  %p1510_p4 = scmp.lt.s32.totalorder %s1508_s14, %s1502_s7 }
 0x1b8   : > { %p1505_p2 = pneg %p1504_p1 }
 0x1b9   : > { %p1511_p7 = por %p1510_p4, %p1509_p3 }
 0x1bb   : > { %p1512_p8 = pnand %p1511_p7, %p1505_p2 }
 0x1bd   : > { %1515 = shalt.err (!%p1512_p8)
}
 0x1be   : > { %s1516_s24 = scalar_lea.hbm %s2812_s5, 1152  ;;  %s1520_s22 = scalar_lea.hbm %s2861_s2, 2304 }
 0x1bf   : > { %p1517_p11 = scmp.ne.s32.totalorder %s2812_s5, %s1516_s24  ;;  %p1521_p0 = scmp.lt.u32.totalorder %s2812_s5, %s2861_s2 }
 0x1c0   : > { %p1522_p6 = scmp.lt.u32.totalorder %s1520_s22, %s1516_s24  ;;  %p1524_p12 = scmp.lt.u32.totalorder %s1516_s24, %s2812_s5 }
 0x1c1   : > { %p1518_p13 = pnand %p1517_p11, %p2933_p10 }
 0x1c2   : > { %p1523_p9 = por %p1522_p6, %p1521_p0 }
 0x1c3   : > { %p1519_p5 = pneg %p1518_p13 }
 0x1c4   : > { %p1525_p1 = por %p1524_p12, %p1523_p9 }
 0x1c6   : > { %p1526_p2 = pnand %p1525_p1, %p1519_p5 }
 0x1c8   : > { %1529 = shalt.err (!%p1526_p2)
}
 0x1c9   : > { %s1580_s28 = smov 128   ;;  %s1581_s29 = smov 8  }
 0x1ca   : > { %1389 = dma.vmem_to_hbm [thread:$0]  (%p2933_p10), %s2814_s4, 1152, %s2812_s5, %s2818_s6, %s1580_s28, %s1580_s28, %s1581_s29  }
 0x1cb PF: > { %p1406_p3 = scmp.ge.s32.totalorder %s1572_s12, 2  ;;  %s1310_s30 = sand.u32 1, %s1560_s9  }
 0x1cc   : > { %p2934_p4 = scmp.ne.s32.totalorder %s2866_s20, 0  ;;  %s1311_s23 = scalar_lea.sflag [#allocation4], %s1310_s30 }
 0x1ce   : > { %p1399_p7 = pnand %p1406_p3, %p2934_p4 }
 0x1d0   : > { %1555 = dma.done.wait (!%p1399_p7), %s1311_s23, 1152  }
 0x1d1   : > { %1557 = vsyncadd (!%p1399_p7), %s1311_s23, 4294966144  ;;  %p14_p8 = scmp.ge.s32.totalorder %s1622_s15, 4   ;;  %s2935_s9 = smov %s1564_s10 }
 0x1d2   : > { %s2936_s10 = smov %s1568_s11  ;;  %s2937_s11 = smov %s1633_s18 }
 0x1d3   : > { %s2938_s12 = smov %s1622_s15  ;;  %16 = sbr.rel (!%p14_p8) target bundleno = 5 (0x5), region = 113 }
 0x1da   :  { %1316 = vsyncpa [#allocation3], 1 }
 0x1db   :  { %1318 = vsyncpa [#allocation3 + $0x1], 1 }
 0x1dc   :  { %1319 = vsyncpa [#allocation6], 1 }
 0x1dd   :  { %1320 = vsyncpa [#allocation4], 1 }
 0x1de   :  { %1322 = vsyncpa [#allocation4 + $0x1], 1 }

</bundles_post_ra>
